<compile_context>
chip_gen: v7x
topology: tpu7x:2x2x1
jax: 0.10.0
libtpu: 0.0.40
codegen_flags: <defaults>
</compile_context>

<pallas_src>
import functools

import numpy as np
import jax
import jax.numpy as jnp
from jax import lax
from jax.experimental import pallas as pl
from jax.experimental.pallas import tpu as pltpu


def _for(lo, hi, body):
    """Static-bound loop: fully unroll short trip counts, else lax.fori_loop."""
    if hi - lo <= 16:
        for t in range(lo, hi):
            body(t)
    else:
        def wrapped(t, carry):
            body(t)
            return carry
        lax.fori_loop(lo, hi, wrapped, 0)


def lstm_predictor_kernel(x_ref, wih1_ref, whh1_ref, b1_ref,
                          w2_ref, b2_ref, wlin_ref, blin_ref,
                          out_ref,
                          h1, c1, prev_out,
                          *, seq_len, future, n_hidden):
    H = n_hidden
    G = 4 * H
    Bp = h1.shape[0]

    # Single invocation -> just zero the recurrent state at the top.
    h1[...] = jnp.zeros_like(h1)
    c1[...] = jnp.zeros_like(c1)
    prev_out[...] = jnp.zeros_like(prev_out)

    # Load weights once; pre-broadcast per-step constants (JAX does not CSE
    # broadcast_in_dim, so keep these out of the time loop).
    wih1_b = jnp.broadcast_to(wih1_ref[...], (Bp, G))   # (Bp, 4H)
    whh1 = whh1_ref[...]                                # (H, 4H)
    b1_b = jnp.broadcast_to(b1_ref[...], (Bp, G))       # (Bp, 4H)
    w2 = w2_ref[...]                                    # (H, 4H) = wih2^T + whh2^T
    b2_b = jnp.broadcast_to(b2_ref[...], (Bp, G))       # (Bp, 4H)
    wlin_b = jnp.broadcast_to(wlin_ref[...], (Bp, H))   # (Bp, H)
    blin_b = jnp.broadcast_to(blin_ref[...], (Bp, 1))   # (Bp, 1)

    def step(x_t):
        """One timestep; x_t is the (Bp, 1) scalar-input column."""
        # ---- layer 1: K=1 input matmul done as a VPU broadcast multiply ----
        gates1 = (x_t * wih1_b
                  + jnp.dot(h1[...], whh1, preferred_element_type=jnp.float32)
                  + b1_b)
        sig1 = jax.nn.sigmoid(gates1)      # full-vreg EUP op
        tnh1 = jnp.tanh(gates1)            # full-vreg EUP op
        c1_new = sig1[:, H:2 * H] * c1[...] + sig1[:, 0:H] * tnh1[:, 2 * H:3 * H]
        h1_new = sig1[:, 3 * H:4 * H] * jnp.tanh(c1_new)

        # ---- layer 2 --------------------------------------------------------
        # Bug-faithful to the original torch forward: lstm2's input AND its
        # recurrent hidden are both the fresh h1_new, and its recurrent cell is
        # the fresh c1_new, so its own (h2, c2) are never carried across time.
        # Do NOT "fix" this — it would change the numerics.
        gates2 = jnp.dot(h1_new, w2, preferred_element_type=jnp.float32) + b2_b
        sig2 = jax.nn.sigmoid(gates2)
        tnh2 = jnp.tanh(gates2)
        c2_new = sig2[:, H:2 * H] * c1_new + sig2[:, 0:H] * tnh2[:, 2 * H:3 * H]
        h2_new = sig2[:, 3 * H:4 * H] * jnp.tanh(c2_new)

        # ---- linear head (H -> 1): VPU mul + lane reduce (no N=1 MXU push) --
        out_t = jnp.sum(h2_new * wlin_b, axis=-1, keepdims=True) + blin_b

        h1[...] = h1_new
        c1[...] = c1_new
        prev_out[...] = out_t
        return out_t

    def observed(t):                       # consume the observed input
        out_ref[t] = step(x_ref[t])

    def generate(t):                       # feed back the previous prediction
        out_ref[t] = step(prev_out[...])

    _for(0, seq_len, observed)
    _for(seq_len, seq_len + future, generate)


def lstm_predictor(x, params, future=0):
    """x: (B, T) float -> (B, T + future) float32."""
    B, T = x.shape
    H = params["whh1_t"].shape[0]
    total = T + future
    Bp = ((B + 7) // 8) * 8                # pad batch to the f32 sublane multiple

    x_f32 = x.astype(jnp.float32)
    # Time-major (T, Bp, 1) slab; padded batch rows are zero and dropped at the end.
    x_tm = jnp.zeros((T, Bp, 1), jnp.float32).at[:, :B, 0].set(jnp.transpose(x_f32))

    # Layer-2 matmul fusion (input == recurrent hidden in the torch forward).
    w2_comb = params["wih2_t"] + params["whh2_t"]

    kernel = functools.partial(lstm_predictor_kernel,
                               seq_len=T, future=future, n_hidden=H)

    def spec2(a):
        return pl.BlockSpec(a.shape, lambda i: (0, 0))

    grid_spec = pltpu.PrefetchScalarGridSpec(
        num_scalar_prefetch=0,
        grid=(1,),
        in_specs=[
            pl.BlockSpec((T, Bp, 1), lambda i: (0, 0, 0)),
            spec2(params["wih1_row"]),
            spec2(params["whh1_t"]),
            spec2(params["b1"]),
            spec2(w2_comb),
            spec2(params["b2"]),
            spec2(params["wlin_row"]),
            spec2(params["blin"]),
        ],
        out_specs=pl.BlockSpec((total, Bp, 1), lambda i: (0, 0, 0)),
        scratch_shapes=[
            pltpu.VMEM((Bp, H), jnp.float32),   # h1
            pltpu.VMEM((Bp, H), jnp.float32),   # c1
            pltpu.VMEM((Bp, 1), jnp.float32),   # previous prediction
        ],
    )

    out_tm = pl.pallas_call(
        kernel,
        out_shape=jax.ShapeDtypeStruct((total, Bp, 1), jnp.float32),
        grid_spec=grid_spec,
        compiler_params=pltpu.CompilerParams(
            dimension_semantics=("arbitrary",)),   # recurrence is sequential
    )(x_tm,
      params["wih1_row"], params["whh1_t"], params["b1"],
      w2_comb, params["b2"],
      params["wlin_row"], params["blin"])

    return jnp.transpose(out_tm[:, :B, 0])         # (B, T + future)


def init_params(key, n_hidden):
    """Deterministic init mirroring torch defaults: U(-1/sqrt(H), 1/sqrt(H))."""
    H = n_hidden
    bound = 1.0 / np.sqrt(H)
    ks = jax.random.split(key, 10)
    u = lambda k, shape: jax.random.uniform(k, shape, jnp.float32, -bound, bound)

    wih1 = u(ks[0], (4 * H, 1));  whh1 = u(ks[1], (4 * H, H))
    bih1 = u(ks[2], (4 * H,));    bhh1 = u(ks[3], (4 * H,))
    wih2 = u(ks[4], (4 * H, H));  whh2 = u(ks[5], (4 * H, H))
    bih2 = u(ks[6], (4 * H,));    bhh2 = u(ks[7], (4 * H,))
    wlin = u(ks[8], (1, H));      blin = u(ks[9], (1,))

    return {
        "wih1_row": wih1.T,                       # (1, 4H)
        "whh1_t": whh1.T,                         # (H, 4H)
        "b1": (bih1 + bhh1).reshape(1, 4 * H),
        "wih2_t": wih2.T,                         # (H, 4H)
        "whh2_t": whh2.T,                         # (H, 4H)
        "b2": (bih2 + bhh2).reshape(1, 4 * H),
        "wlin_row": wlin,                         # (1, H)
        "blin": blin.reshape(1, 1),
    }


def reference_forward(x, p, future=0):
    """Pure-JAX replica of the (bug-faithful) torch forward, for verification."""
    B = x.shape[0]
    H = p["whh1_t"].shape[0]

    def cell(x_in, h, c, wih_t, whh_t, b):
        g = x_in @ wih_t + h @ whh_t + b
        i = jax.nn.sigmoid(g[:, :H]); f = jax.nn.sigmoid(g[:, H:2 * H])
        gg = jnp.tanh(g[:, 2 * H:3 * H]); o = jax.nn.sigmoid(g[:, 3 * H:])
        c_new = f * c + i * gg
        return o * jnp.tanh(c_new), c_new

    h1 = jnp.zeros((B, H), jnp.float32)
    c1 = jnp.zeros((B, H), jnp.float32)
    outputs, out = [], None
    for t in range(x.shape[1]):
        xt = x[:, t:t + 1]
        h1, c1 = cell(xt, h1, c1, p["wih1_row"], p["whh1_t"], p["b1"])
        h2, _ = cell(h1, h1, c1, p["wih2_t"], p["whh2_t"], p["b2"])
        out = h2 @ p["wlin_row"].T + p["blin"]
        outputs.append(out)
    for _ in range(future):
        h1, c1 = cell(out, h1, c1, p["wih1_row"], p["whh1_t"], p["b1"])
        h2, _ = cell(h1, h1, c1, p["wih2_t"], p["whh2_t"], p["b2"])
        out = h2 @ p["wlin_row"].T + p["blin"]
        outputs.append(out)
    return jnp.concatenate(outputs, axis=1)


if __name__ == "__main__":
    B, T, H, FUTURE = 2, 8, 32, 2

    key = jax.random.PRNGKey(0)
    k_x, k_p = jax.random.split(key)
    x = jax.random.normal(k_x, (B, T), jnp.float32)
    params = init_params(k_p, H)

    out = lstm_predictor(x, params, future=FUTURE)
    out = jax.block_until_ready(out)

    assert out.shape == (B, T + FUTURE), out.shape

    ref = jax.block_until_ready(reference_forward(x, params, future=FUTURE))
    np.testing.assert_allclose(np.asarray(out), np.asarray(ref),
                               rtol=5e-3, atol=1e-4)

    print("KERNEL_OK")
</pallas_src>

<mosaic_0001>
module attributes {stable_mosaic.version = 11 : i64} {
  func.func @lstm_predictor_kernel(%arg0: i32, %arg1: memref<8x8x1xf32, #tpu.memory_space<vmem>>, %arg2: memref<1x128xf32, #tpu.memory_space<vmem>>, %arg3: memref<32x128xf32, #tpu.memory_space<vmem>>, %arg4: memref<1x128xf32, #tpu.memory_space<vmem>>, %arg5: memref<32x128xf32, #tpu.memory_space<vmem>>, %arg6: memref<1x128xf32, #tpu.memory_space<vmem>>, %arg7: memref<1x32xf32, #tpu.memory_space<vmem>>, %arg8: memref<1x1xf32, #tpu.memory_space<vmem>>, %arg9: memref<10x8x1xf32, #tpu.memory_space<vmem>>, %arg10: memref<8x32xf32, #tpu.memory_space<vmem>>, %arg11: memref<8x32xf32, #tpu.memory_space<vmem>>, %arg12: memref<8x1xf32, #tpu.memory_space<vmem>>) attributes {dimension_semantics = [#tpu.dimension_semantics<arbitrary>], iteration_bounds = array<i64: 1>, scalar_prefetch = 0 : i64, scratch_operands = 3 : i64, tpu.core_type = #tpu.core_type<tc>, window_params = [{pipeline_mode = #tpu.pipeline_mode<synchronous>, transform_indices = @transform_0, window_bounds = array<i64: 8, 8, 1>}, {pipeline_mode = #tpu.pipeline_mode<synchronous>, transform_indices = @transform_1, window_bounds = array<i64: 1, 128>}, {pipeline_mode = #tpu.pipeline_mode<synchronous>, transform_indices = @transform_2, window_bounds = array<i64: 32, 128>}, {pipeline_mode = #tpu.pipeline_mode<synchronous>, transform_indices = @transform_3, window_bounds = array<i64: 1, 128>}, {pipeline_mode = #tpu.pipeline_mode<synchronous>, transform_indices = @transform_4, window_bounds = array<i64: 32, 128>}, {pipeline_mode = #tpu.pipeline_mode<synchronous>, transform_indices = @transform_5, window_bounds = array<i64: 1, 128>}, {pipeline_mode = #tpu.pipeline_mode<synchronous>, transform_indices = @transform_6, window_bounds = array<i64: 1, 32>}, {pipeline_mode = #tpu.pipeline_mode<synchronous>, transform_indices = @transform_7, window_bounds = array<i64: 1, 1>}, {pipeline_mode = #tpu.pipeline_mode<synchronous>, transform_indices = @transform_8, window_bounds = array<i64: 10, 8, 1>}]} {
    %cst = arith.constant 0.000000e+00 : f32
    %0 = vector.broadcast %cst : f32 to vector<8x32xf32>
    %c0 = arith.constant 0 : index
    %c0_0 = arith.constant 0 : index
    %1 = vector.load %arg10[%c0, %c0_0] : memref<8x32xf32, #tpu.memory_space<vmem>>, vector<8x32xf32>
    tpu.vector_store %arg10[%c0, %c0_0], %0 {strides = array<i32>} : memref<8x32xf32, #tpu.memory_space<vmem>>, vector<8x32xf32>,
    %cst_1 = arith.constant 0.000000e+00 : f32
    %2 = vector.broadcast %cst_1 : f32 to vector<8x32xf32>
    %c0_2 = arith.constant 0 : index
    %c0_3 = arith.constant 0 : index
    %3 = vector.load %arg11[%c0_2, %c0_3] : memref<8x32xf32, #tpu.memory_space<vmem>>, vector<8x32xf32>
    tpu.vector_store %arg11[%c0_2, %c0_3], %2 {strides = array<i32>} : memref<8x32xf32, #tpu.memory_space<vmem>>, vector<8x32xf32>,
    %cst_4 = arith.constant 0.000000e+00 : f32
    %4 = vector.broadcast %cst_4 : f32 to vector<8x1xf32>
    %c0_5 = arith.constant 0 : index
    %c0_6 = arith.constant 0 : index
    %5 = vector.load %arg12[%c0_5, %c0_6] : memref<8x1xf32, #tpu.memory_space<vmem>>, vector<8x1xf32>
    tpu.vector_store %arg12[%c0_5, %c0_6], %4 {strides = array<i32>} : memref<8x1xf32, #tpu.memory_space<vmem>>, vector<8x1xf32>,
    %c0_7 = arith.constant 0 : index
    %c0_8 = arith.constant 0 : index
    %6 = vector.load %arg2[%c0_7, %c0_8] : memref<1x128xf32, #tpu.memory_space<vmem>>, vector<1x128xf32>
    %7 = vector.shape_cast %6 : vector<1x128xf32> to vector<1x128xf32>
    %8 = vector.broadcast %7 : vector<1x128xf32> to vector<8x128xf32>
    %c0_9 = arith.constant 0 : index
    %c0_10 = arith.constant 0 : index
    %9 = vector.load %arg3[%c0_9, %c0_10] : memref<32x128xf32, #tpu.memory_space<vmem>>, vector<32x128xf32>
    %c0_11 = arith.constant 0 : index
    %c0_12 = arith.constant 0 : index
    %10 = vector.load %arg4[%c0_11, %c0_12] : memref<1x128xf32, #tpu.memory_space<vmem>>, vector<1x128xf32>
    %11 = vector.shape_cast %10 : vector<1x128xf32> to vector<1x128xf32>
    %12 = vector.broadcast %11 : vector<1x128xf32> to vector<8x128xf32>
    %c0_13 = arith.constant 0 : index
    %c0_14 = arith.constant 0 : index
    %13 = vector.load %arg5[%c0_13, %c0_14] : memref<32x128xf32, #tpu.memory_space<vmem>>, vector<32x128xf32>
    %c0_15 = arith.constant 0 : index
    %c0_16 = arith.constant 0 : index
    %14 = vector.load %arg6[%c0_15, %c0_16] : memref<1x128xf32, #tpu.memory_space<vmem>>, vector<1x128xf32>
    %15 = vector.shape_cast %14 : vector<1x128xf32> to vector<1x128xf32>
    %16 = vector.broadcast %15 : vector<1x128xf32> to vector<8x128xf32>
    %c0_17 = arith.constant 0 : index
    %c0_18 = arith.constant 0 : index
    %17 = vector.load %arg7[%c0_17, %c0_18] : memref<1x32xf32, #tpu.memory_space<vmem>>, vector<1x32xf32>
    %18 = vector.shape_cast %17 : vector<1x32xf32> to vector<1x32xf32>
    %19 = vector.broadcast %18 : vector<1x32xf32> to vector<8x32xf32>
    %c0_19 = arith.constant 0 : index
    %c0_20 = arith.constant 0 : index
    %20 = vector.load %arg8[%c0_19, %c0_20] : memref<1x1xf32, #tpu.memory_space<vmem>>, vector<1x1xf32>
    %21 = vector.shape_cast %20 : vector<1x1xf32> to vector<1x1xf32>
    %22 = vector.broadcast %21 : vector<1x1xf32> to vector<8x1xf32>
    %c0_21 = arith.constant 0 : index
    %c0_22 = arith.constant 0 : index
    %c0_23 = arith.constant 0 : index
    %23 = vector.load %arg1[%c0_21, %c0_22, %c0_23] : memref<8x8x1xf32, #tpu.memory_space<vmem>>, vector<1x8x1xf32>
    %24 = vector.shape_cast %23 : vector<1x8x1xf32> to vector<8x1xf32>
    %25 = vector.broadcast %24 : vector<8x1xf32> to vector<8x128xf32>
    %26 = arith.mulf %25, %8 : vector<8x128xf32>
    %c0_24 = arith.constant 0 : index
    %c0_25 = arith.constant 0 : index
    %27 = vector.load %arg10[%c0_24, %c0_25] : memref<8x32xf32, #tpu.memory_space<vmem>>, vector<8x32xf32>
    %cst_26 = arith.constant dense<0.000000e+00> : vector<8x128xf32>
    %28 = tpu.matmul %27, %9, %cst_26 {dimension_numbers = #tpu.dot_dimension_numbers<[1], [0], [0], [1], [0, 0, 1, 1], [], []>} : vector<8x32xf32>, vector<32x128xf32>, vector<8x128xf32> -> vector<8x128xf32>
    %29 = arith.addf %26, %28 : vector<8x128xf32>
    %30 = arith.addf %29, %12 : vector<8x128xf32>
    %31 = arith.negf %30 : vector<8x128xf32>
    %32 = math.exp %31 : vector<8x128xf32>
    %cst_27 = arith.constant 1.000000e+00 : f32
    %33 = vector.broadcast %cst_27 : f32 to vector<8x128xf32>
    %34 = arith.addf %33, %32 : vector<8x128xf32>
    %35 = arith.divf %33, %34 : vector<8x128xf32>
    %36 = math.tanh %30 : vector<8x128xf32>
    %37 = vector.extract_strided_slice %35 {offsets = [0, 32], sizes = [8, 32], strides = [1, 1]} : vector<8x128xf32> to vector<8x32xf32>
    %c0_28 = arith.constant 0 : index
    %c0_29 = arith.constant 0 : index
    %38 = vector.load %arg11[%c0_28, %c0_29] : memref<8x32xf32, #tpu.memory_space<vmem>>, vector<8x32xf32>
    %39 = arith.mulf %37, %38 : vector<8x32xf32>
    %40 = vector.extract_strided_slice %35 {offsets = [0, 0], sizes = [8, 32], strides = [1, 1]} : vector<8x128xf32> to vector<8x32xf32>
    %41 = vector.extract_strided_slice %36 {offsets = [0, 64], sizes = [8, 32], strides = [1, 1]} : vector<8x128xf32> to vector<8x32xf32>
    %42 = arith.mulf %40, %41 : vector<8x32xf32>
    %43 = arith.addf %39, %42 : vector<8x32xf32>
    %44 = vector.extract_strided_slice %35 {offsets = [0, 96], sizes = [8, 32], strides = [1, 1]} : vector<8x128xf32> to vector<8x32xf32>
    %45 = math.tanh %43 : vector<8x32xf32>
    %46 = arith.mulf %44, %45 : vector<8x32xf32>
    %cst_30 = arith.constant dense<0.000000e+00> : vector<8x128xf32>
    %47 = tpu.matmul %46, %13, %cst_30 {dimension_numbers = #tpu.dot_dimension_numbers<[1], [0], [0], [1], [0, 0, 1, 1], [], []>} : vector<8x32xf32>, vector<32x128xf32>, vector<8x128xf32> -> vector<8x128xf32>
    %48 = arith.addf %47, %16 : vector<8x128xf32>
    %49 = arith.negf %48 : vector<8x128xf32>
    %50 = math.exp %49 : vector<8x128xf32>
    %cst_31 = arith.constant 1.000000e+00 : f32
    %51 = vector.broadcast %cst_31 : f32 to vector<8x128xf32>
    %52 = arith.addf %51, %50 : vector<8x128xf32>
    %53 = arith.divf %51, %52 : vector<8x128xf32>
    %54 = math.tanh %48 : vector<8x128xf32>
    %55 = vector.extract_strided_slice %53 {offsets = [0, 32], sizes = [8, 32], strides = [1, 1]} : vector<8x128xf32> to vector<8x32xf32>
    %56 = arith.mulf %55, %43 : vector<8x32xf32>
    %57 = vector.extract_strided_slice %53 {offsets = [0, 0], sizes = [8, 32], strides = [1, 1]} : vector<8x128xf32> to vector<8x32xf32>
    %58 = vector.extract_strided_slice %54 {offsets = [0, 64], sizes = [8, 32], strides = [1, 1]} : vector<8x128xf32> to vector<8x32xf32>
    %59 = arith.mulf %57, %58 : vector<8x32xf32>
    %60 = arith.addf %56, %59 : vector<8x32xf32>
    %61 = vector.extract_strided_slice %53 {offsets = [0, 96], sizes = [8, 32], strides = [1, 1]} : vector<8x128xf32> to vector<8x32xf32>
    %62 = math.tanh %60 : vector<8x32xf32>
    %63 = arith.mulf %61, %62 : vector<8x32xf32>
    %64 = arith.mulf %63, %19 : vector<8x32xf32>
    %cst_32 = arith.constant dense<0.000000e+00> : vector<8xf32>
    %65 = vector.multi_reduction <add>, %64, %cst_32 [1] : vector<8x32xf32> to vector<8xf32>
    %66 = vector.shape_cast %65 : vector<8xf32> to vector<8x1xf32>
    %67 = arith.addf %66, %22 : vector<8x1xf32>
    %c0_33 = arith.constant 0 : index
    %c0_34 = arith.constant 0 : index
    %68 = vector.load %arg10[%c0_33, %c0_34] : memref<8x32xf32, #tpu.memory_space<vmem>>, vector<8x32xf32>
    tpu.vector_store %arg10[%c0_33, %c0_34], %46 {strides = array<i32>} : memref<8x32xf32, #tpu.memory_space<vmem>>, vector<8x32xf32>,
    %c0_35 = arith.constant 0 : index
    %c0_36 = arith.constant 0 : index
    %69 = vector.load %arg11[%c0_35, %c0_36] : memref<8x32xf32, #tpu.memory_space<vmem>>, vector<8x32xf32>
    tpu.vector_store %arg11[%c0_35, %c0_36], %43 {strides = array<i32>} : memref<8x32xf32, #tpu.memory_space<vmem>>, vector<8x32xf32>,
    %c0_37 = arith.constant 0 : index
    %c0_38 = arith.constant 0 : index
    %70 = vector.load %arg12[%c0_37, %c0_38] : memref<8x1xf32, #tpu.memory_space<vmem>>, vector<8x1xf32>
    tpu.vector_store %arg12[%c0_37, %c0_38], %67 {strides = array<i32>} : memref<8x1xf32, #tpu.memory_space<vmem>>, vector<8x1xf32>,
    %c0_39 = arith.constant 0 : index
    %c0_40 = arith.constant 0 : index
    %c0_41 = arith.constant 0 : index
    %71 = vector.load %arg9[%c0_39, %c0_40, %c0_41] : memref<10x8x1xf32, #tpu.memory_space<vmem>>, vector<1x8x1xf32>
    %72 = vector.shape_cast %71 : vector<1x8x1xf32> to vector<8x1xf32>
    %73 = vector.shape_cast %67 : vector<8x1xf32> to vector<1x8x1xf32>
    tpu.vector_store %arg9[%c0_39, %c0_40, %c0_41], %73 {strides = array<i32>} : memref<10x8x1xf32, #tpu.memory_space<vmem>>, vector<1x8x1xf32>,
    %c1 = arith.constant 1 : index
    %c0_42 = arith.constant 0 : index
    %c0_43 = arith.constant 0 : index
    %74 = vector.load %arg1[%c1, %c0_42, %c0_43] : memref<8x8x1xf32, #tpu.memory_space<vmem>>, vector<1x8x1xf32>
    %75 = vector.shape_cast %74 : vector<1x8x1xf32> to vector<8x1xf32>
    %76 = vector.broadcast %75 : vector<8x1xf32> to vector<8x128xf32>
    %77 = arith.mulf %76, %8 : vector<8x128xf32>
    %c0_44 = arith.constant 0 : index
    %c0_45 = arith.constant 0 : index
    %78 = vector.load %arg10[%c0_44, %c0_45] : memref<8x32xf32, #tpu.memory_space<vmem>>, vector<8x32xf32>
    %cst_46 = arith.constant dense<0.000000e+00> : vector<8x128xf32>
    %79 = tpu.matmul %78, %9, %cst_46 {dimension_numbers = #tpu.dot_dimension_numbers<[1], [0], [0], [1], [0, 0, 1, 1], [], []>} : vector<8x32xf32>, vector<32x128xf32>, vector<8x128xf32> -> vector<8x128xf32>
    %80 = arith.addf %77, %79 : vector<8x128xf32>
    %81 = arith.addf %80, %12 : vector<8x128xf32>
    %82 = arith.negf %81 : vector<8x128xf32>
    %83 = math.exp %82 : vector<8x128xf32>
    %cst_47 = arith.constant 1.000000e+00 : f32
    %84 = vector.broadcast %cst_47 : f32 to vector<8x128xf32>
    %85 = arith.addf %84, %83 : vector<8x128xf32>
    %86 = arith.divf %84, %85 : vector<8x128xf32>
    %87 = math.tanh %81 : vector<8x128xf32>
    %88 = vector.extract_strided_slice %86 {offsets = [0, 32], sizes = [8, 32], strides = [1, 1]} : vector<8x128xf32> to vector<8x32xf32>
    %c0_48 = arith.constant 0 : index
    %c0_49 = arith.constant 0 : index
    %89 = vector.load %arg11[%c0_48, %c0_49] : memref<8x32xf32, #tpu.memory_space<vmem>>, vector<8x32xf32>
    %90 = arith.mulf %88, %89 : vector<8x32xf32>
    %91 = vector.extract_strided_slice %86 {offsets = [0, 0], sizes = [8, 32], strides = [1, 1]} : vector<8x128xf32> to vector<8x32xf32>
    %92 = vector.extract_strided_slice %87 {offsets = [0, 64], sizes = [8, 32], strides = [1, 1]} : vector<8x128xf32> to vector<8x32xf32>
    %93 = arith.mulf %91, %92 : vector<8x32xf32>
    %94 = arith.addf %90, %93 : vector<8x32xf32>
    %95 = vector.extract_strided_slice %86 {offsets = [0, 96], sizes = [8, 32], strides = [1, 1]} : vector<8x128xf32> to vector<8x32xf32>
    %96 = math.tanh %94 : vector<8x32xf32>
    %97 = arith.mulf %95, %96 : vector<8x32xf32>
    %cst_50 = arith.constant dense<0.000000e+00> : vector<8x128xf32>
    %98 = tpu.matmul %97, %13, %cst_50 {dimension_numbers = #tpu.dot_dimension_numbers<[1], [0], [0], [1], [0, 0, 1, 1], [], []>} : vector<8x32xf32>, vector<32x128xf32>, vector<8x128xf32> -> vector<8x128xf32>
    %99 = arith.addf %98, %16 : vector<8x128xf32>
    %100 = arith.negf %99 : vector<8x128xf32>
    %101 = math.exp %100 : vector<8x128xf32>
    %cst_51 = arith.constant 1.000000e+00 : f32
    %102 = vector.broadcast %cst_51 : f32 to vector<8x128xf32>
    %103 = arith.addf %102, %101 : vector<8x128xf32>
    %104 = arith.divf %102, %103 : vector<8x128xf32>
    %105 = math.tanh %99 : vector<8x128xf32>
    %106 = vector.extract_strided_slice %104 {offsets = [0, 32], sizes = [8, 32], strides = [1, 1]} : vector<8x128xf32> to vector<8x32xf32>
    %107 = arith.mulf %106, %94 : vector<8x32xf32>
    %108 = vector.extract_strided_slice %104 {offsets = [0, 0], sizes = [8, 32], strides = [1, 1]} : vector<8x128xf32> to vector<8x32xf32>
    %109 = vector.extract_strided_slice %105 {offsets = [0, 64], sizes = [8, 32], strides = [1, 1]} : vector<8x128xf32> to vector<8x32xf32>
    %110 = arith.mulf %108, %109 : vector<8x32xf32>
    %111 = arith.addf %107, %110 : vector<8x32xf32>
    %112 = vector.extract_strided_slice %104 {offsets = [0, 96], sizes = [8, 32], strides = [1, 1]} : vector<8x128xf32> to vector<8x32xf32>
    %113 = math.tanh %111 : vector<8x32xf32>
    %114 = arith.mulf %112, %113 : vector<8x32xf32>
    %115 = arith.mulf %114, %19 : vector<8x32xf32>
    %cst_52 = arith.constant dense<0.000000e+00> : vector<8xf32>
    %116 = vector.multi_reduction <add>, %115, %cst_52 [1] : vector<8x32xf32> to vector<8xf32>
    %117 = vector.shape_cast %116 : vector<8xf32> to vector<8x1xf32>
    %118 = arith.addf %117, %22 : vector<8x1xf32>
    %c0_53 = arith.constant 0 : index
    %c0_54 = arith.constant 0 : index
    %119 = vector.load %arg10[%c0_53, %c0_54] : memref<8x32xf32, #tpu.memory_space<vmem>>, vector<8x32xf32>
    tpu.vector_store %arg10[%c0_53, %c0_54], %97 {strides = array<i32>} : memref<8x32xf32, #tpu.memory_space<vmem>>, vector<8x32xf32>,
    %c0_55 = arith.constant 0 : index
    %c0_56 = arith.constant 0 : index
    %120 = vector.load %arg11[%c0_55, %c0_56] : memref<8x32xf32, #tpu.memory_space<vmem>>, vector<8x32xf32>
    tpu.vector_store %arg11[%c0_55, %c0_56], %94 {strides = array<i32>} : memref<8x32xf32, #tpu.memory_space<vmem>>, vector<8x32xf32>,
    %c0_57 = arith.constant 0 : index
    %c0_58 = arith.constant 0 : index
    %121 = vector.load %arg12[%c0_57, %c0_58] : memref<8x1xf32, #tpu.memory_space<vmem>>, vector<8x1xf32>
    tpu.vector_store %arg12[%c0_57, %c0_58], %118 {strides = array<i32>} : memref<8x1xf32, #tpu.memory_space<vmem>>, vector<8x1xf32>,
    %c1_59 = arith.constant 1 : index
    %c0_60 = arith.constant 0 : index
    %c0_61 = arith.constant 0 : index
    %122 = vector.load %arg9[%c1_59, %c0_60, %c0_61] : memref<10x8x1xf32, #tpu.memory_space<vmem>>, vector<1x8x1xf32>
    %123 = vector.shape_cast %122 : vector<1x8x1xf32> to vector<8x1xf32>
    %124 = vector.shape_cast %118 : vector<8x1xf32> to vector<1x8x1xf32>
    tpu.vector_store %arg9[%c1_59, %c0_60, %c0_61], %124 {strides = array<i32>} : memref<10x8x1xf32, #tpu.memory_space<vmem>>, vector<1x8x1xf32>,
    %c2 = arith.constant 2 : index
    %c0_62 = arith.constant 0 : index
    %c0_63 = arith.constant 0 : index
    %125 = vector.load %arg1[%c2, %c0_62, %c0_63] : memref<8x8x1xf32, #tpu.memory_space<vmem>>, vector<1x8x1xf32>
    %126 = vector.shape_cast %125 : vector<1x8x1xf32> to vector<8x1xf32>
    %127 = vector.broadcast %126 : vector<8x1xf32> to vector<8x128xf32>
    %128 = arith.mulf %127, %8 : vector<8x128xf32>
    %c0_64 = arith.constant 0 : index
    %c0_65 = arith.constant 0 : index
    %129 = vector.load %arg10[%c0_64, %c0_65] : memref<8x32xf32, #tpu.memory_space<vmem>>, vector<8x32xf32>
    %cst_66 = arith.constant dense<0.000000e+00> : vector<8x128xf32>
    %130 = tpu.matmul %129, %9, %cst_66 {dimension_numbers = #tpu.dot_dimension_numbers<[1], [0], [0], [1], [0, 0, 1, 1], [], []>} : vector<8x32xf32>, vector<32x128xf32>, vector<8x128xf32> -> vector<8x128xf32>
    %131 = arith.addf %128, %130 : vector<8x128xf32>
    %132 = arith.addf %131, %12 : vector<8x128xf32>
    %133 = arith.negf %132 : vector<8x128xf32>
    %134 = math.exp %133 : vector<8x128xf32>
    %cst_67 = arith.constant 1.000000e+00 : f32
    %135 = vector.broadcast %cst_67 : f32 to vector<8x128xf32>
    %136 = arith.addf %135, %134 : vector<8x128xf32>
    %137 = arith.divf %135, %136 : vector<8x128xf32>
    %138 = math.tanh %132 : vector<8x128xf32>
    %139 = vector.extract_strided_slice %137 {offsets = [0, 32], sizes = [8, 32], strides = [1, 1]} : vector<8x128xf32> to vector<8x32xf32>
    %c0_68 = arith.constant 0 : index
    %c0_69 = arith.constant 0 : index
    %140 = vector.load %arg11[%c0_68, %c0_69] : memref<8x32xf32, #tpu.memory_space<vmem>>, vector<8x32xf32>
    %141 = arith.mulf %139, %140 : vector<8x32xf32>
    %142 = vector.extract_strided_slice %137 {offsets = [0, 0], sizes = [8, 32], strides = [1, 1]} : vector<8x128xf32> to vector<8x32xf32>
    %143 = vector.extract_strided_slice %138 {offsets = [0, 64], sizes = [8, 32], strides = [1, 1]} : vector<8x128xf32> to vector<8x32xf32>
    %144 = arith.mulf %142, %143 : vector<8x32xf32>
    %145 = arith.addf %141, %144 : vector<8x32xf32>
    %146 = vector.extract_strided_slice %137 {offsets = [0, 96], sizes = [8, 32], strides = [1, 1]} : vector<8x128xf32> to vector<8x32xf32>
    %147 = math.tanh %145 : vector<8x32xf32>
    %148 = arith.mulf %146, %147 : vector<8x32xf32>
    %cst_70 = arith.constant dense<0.000000e+00> : vector<8x128xf32>
    %149 = tpu.matmul %148, %13, %cst_70 {dimension_numbers = #tpu.dot_dimension_numbers<[1], [0], [0], [1], [0, 0, 1, 1], [], []>} : vector<8x32xf32>, vector<32x128xf32>, vector<8x128xf32> -> vector<8x128xf32>
    %150 = arith.addf %149, %16 : vector<8x128xf32>
    %151 = arith.negf %150 : vector<8x128xf32>
    %152 = math.exp %151 : vector<8x128xf32>
    %cst_71 = arith.constant 1.000000e+00 : f32
    %153 = vector.broadcast %cst_71 : f32 to vector<8x128xf32>
    %154 = arith.addf %153, %152 : vector<8x128xf32>
    %155 = arith.divf %153, %154 : vector<8x128xf32>
    %156 = math.tanh %150 : vector<8x128xf32>
    %157 = vector.extract_strided_slice %155 {offsets = [0, 32], sizes = [8, 32], strides = [1, 1]} : vector<8x128xf32> to vector<8x32xf32>
    %158 = arith.mulf %157, %145 : vector<8x32xf32>
    %159 = vector.extract_strided_slice %155 {offsets = [0, 0], sizes = [8, 32], strides = [1, 1]} : vector<8x128xf32> to vector<8x32xf32>
    %160 = vector.extract_strided_slice %156 {offsets = [0, 64], sizes = [8, 32], strides = [1, 1]} : vector<8x128xf32> to vector<8x32xf32>
    %161 = arith.mulf %159, %160 : vector<8x32xf32>
    %162 = arith.addf %158, %161 : vector<8x32xf32>
    %163 = vector.extract_strided_slice %155 {offsets = [0, 96], sizes = [8, 32], strides = [1, 1]} : vector<8x128xf32> to vector<8x32xf32>
    %164 = math.tanh %162 : vector<8x32xf32>
    %165 = arith.mulf %163, %164 : vector<8x32xf32>
    %166 = arith.mulf %165, %19 : vector<8x32xf32>
    %cst_72 = arith.constant dense<0.000000e+00> : vector<8xf32>
    %167 = vector.multi_reduction <add>, %166, %cst_72 [1] : vector<8x32xf32> to vector<8xf32>
    %168 = vector.shape_cast %167 : vector<8xf32> to vector<8x1xf32>
    %169 = arith.addf %168, %22 : vector<8x1xf32>
    %c0_73 = arith.constant 0 : index
    %c0_74 = arith.constant 0 : index
    %170 = vector.load %arg10[%c0_73, %c0_74] : memref<8x32xf32, #tpu.memory_space<vmem>>, vector<8x32xf32>
    tpu.vector_store %arg10[%c0_73, %c0_74], %148 {strides = array<i32>} : memref<8x32xf32, #tpu.memory_space<vmem>>, vector<8x32xf32>,
    %c0_75 = arith.constant 0 : index
    %c0_76 = arith.constant 0 : index
    %171 = vector.load %arg11[%c0_75, %c0_76] : memref<8x32xf32, #tpu.memory_space<vmem>>, vector<8x32xf32>
    tpu.vector_store %arg11[%c0_75, %c0_76], %145 {strides = array<i32>} : memref<8x32xf32, #tpu.memory_space<vmem>>, vector<8x32xf32>,
    %c0_77 = arith.constant 0 : index
    %c0_78 = arith.constant 0 : index
    %172 = vector.load %arg12[%c0_77, %c0_78] : memref<8x1xf32, #tpu.memory_space<vmem>>, vector<8x1xf32>
    tpu.vector_store %arg12[%c0_77, %c0_78], %169 {strides = array<i32>} : memref<8x1xf32, #tpu.memory_space<vmem>>, vector<8x1xf32>,
    %c2_79 = arith.constant 2 : index
    %c0_80 = arith.constant 0 : index
    %c0_81 = arith.constant 0 : index
    %173 = vector.load %arg9[%c2_79, %c0_80, %c0_81] : memref<10x8x1xf32, #tpu.memory_space<vmem>>, vector<1x8x1xf32>
    %174 = vector.shape_cast %173 : vector<1x8x1xf32> to vector<8x1xf32>
    %175 = vector.shape_cast %169 : vector<8x1xf32> to vector<1x8x1xf32>
    tpu.vector_store %arg9[%c2_79, %c0_80, %c0_81], %175 {strides = array<i32>} : memref<10x8x1xf32, #tpu.memory_space<vmem>>, vector<1x8x1xf32>,
    %c3 = arith.constant 3 : index
    %c0_82 = arith.constant 0 : index
    %c0_83 = arith.constant 0 : index
    %176 = vector.load %arg1[%c3, %c0_82, %c0_83] : memref<8x8x1xf32, #tpu.memory_space<vmem>>, vector<1x8x1xf32>
    %177 = vector.shape_cast %176 : vector<1x8x1xf32> to vector<8x1xf32>
    %178 = vector.broadcast %177 : vector<8x1xf32> to vector<8x128xf32>
    %179 = arith.mulf %178, %8 : vector<8x128xf32>
    %c0_84 = arith.constant 0 : index
    %c0_85 = arith.constant 0 : index
    %180 = vector.load %arg10[%c0_84, %c0_85] : memref<8x32xf32, #tpu.memory_space<vmem>>, vector<8x32xf32>
    %cst_86 = arith.constant dense<0.000000e+00> : vector<8x128xf32>
    %181 = tpu.matmul %180, %9, %cst_86 {dimension_numbers = #tpu.dot_dimension_numbers<[1], [0], [0], [1], [0, 0, 1, 1], [], []>} : vector<8x32xf32>, vector<32x128xf32>, vector<8x128xf32> -> vector<8x128xf32>
    %182 = arith.addf %179, %181 : vector<8x128xf32>
    %183 = arith.addf %182, %12 : vector<8x128xf32>
    %184 = arith.negf %183 : vector<8x128xf32>
    %185 = math.exp %184 : vector<8x128xf32>
    %cst_87 = arith.constant 1.000000e+00 : f32
    %186 = vector.broadcast %cst_87 : f32 to vector<8x128xf32>
    %187 = arith.addf %186, %185 : vector<8x128xf32>
    %188 = arith.divf %186, %187 : vector<8x128xf32>
    %189 = math.tanh %183 : vector<8x128xf32>
    %190 = vector.extract_strided_slice %188 {offsets = [0, 32], sizes = [8, 32], strides = [1, 1]} : vector<8x128xf32> to vector<8x32xf32>
    %c0_88 = arith.constant 0 : index
    %c0_89 = arith.constant 0 : index
    %191 = vector.load %arg11[%c0_88, %c0_89] : memref<8x32xf32, #tpu.memory_space<vmem>>, vector<8x32xf32>
    %192 = arith.mulf %190, %191 : vector<8x32xf32>
    %193 = vector.extract_strided_slice %188 {offsets = [0, 0], sizes = [8, 32], strides = [1, 1]} : vector<8x128xf32> to vector<8x32xf32>
    %194 = vector.extract_strided_slice %189 {offsets = [0, 64], sizes = [8, 32], strides = [1, 1]} : vector<8x128xf32> to vector<8x32xf32>
    %195 = arith.mulf %193, %194 : vector<8x32xf32>
    %196 = arith.addf %192, %195 : vector<8x32xf32>
    %197 = vector.extract_strided_slice %188 {offsets = [0, 96], sizes = [8, 32], strides = [1, 1]} : vector<8x128xf32> to vector<8x32xf32>
    %198 = math.tanh %196 : vector<8x32xf32>
    %199 = arith.mulf %197, %198 : vector<8x32xf32>
    %cst_90 = arith.constant dense<0.000000e+00> : vector<8x128xf32>
    %200 = tpu.matmul %199, %13, %cst_90 {dimension_numbers = #tpu.dot_dimension_numbers<[1], [0], [0], [1], [0, 0, 1, 1], [], []>} : vector<8x32xf32>, vector<32x128xf32>, vector<8x128xf32> -> vector<8x128xf32>
    %201 = arith.addf %200, %16 : vector<8x128xf32>
    %202 = arith.negf %201 : vector<8x128xf32>
    %203 = math.exp %202 : vector<8x128xf32>
    %cst_91 = arith.constant 1.000000e+00 : f32
    %204 = vector.broadcast %cst_91 : f32 to vector<8x128xf32>
    %205 = arith.addf %204, %203 : vector<8x128xf32>
    %206 = arith.divf %204, %205 : vector<8x128xf32>
    %207 = math.tanh %201 : vector<8x128xf32>
    %208 = vector.extract_strided_slice %206 {offsets = [0, 32], sizes = [8, 32], strides = [1, 1]} : vector<8x128xf32> to vector<8x32xf32>
    %209 = arith.mulf %208, %196 : vector<8x32xf32>
    %210 = vector.extract_strided_slice %206 {offsets = [0, 0], sizes = [8, 32], strides = [1, 1]} : vector<8x128xf32> to vector<8x32xf32>
    %211 = vector.extract_strided_slice %207 {offsets = [0, 64], sizes = [8, 32], strides = [1, 1]} : vector<8x128xf32> to vector<8x32xf32>
    %212 = arith.mulf %210, %211 : vector<8x32xf32>
    %213 = arith.addf %209, %212 : vector<8x32xf32>
    %214 = vector.extract_strided_slice %206 {offsets = [0, 96], sizes = [8, 32], strides = [1, 1]} : vector<8x128xf32> to vector<8x32xf32>
    %215 = math.tanh %213 : vector<8x32xf32>
    %216 = arith.mulf %214, %215 : vector<8x32xf32>
    %217 = arith.mulf %216, %19 : vector<8x32xf32>
    %cst_92 = arith.constant dense<0.000000e+00> : vector<8xf32>
    %218 = vector.multi_reduction <add>, %217, %cst_92 [1] : vector<8x32xf32> to vector<8xf32>
    %219 = vector.shape_cast %218 : vector<8xf32> to vector<8x1xf32>
    %220 = arith.addf %219, %22 : vector<8x1xf32>
    %c0_93 = arith.constant 0 : index
    %c0_94 = arith.constant 0 : index
    %221 = vector.load %arg10[%c0_93, %c0_94] : memref<8x32xf32, #tpu.memory_space<vmem>>, vector<8x32xf32>
    tpu.vector_store %arg10[%c0_93, %c0_94], %199 {strides = array<i32>} : memref<8x32xf32, #tpu.memory_space<vmem>>, vector<8x32xf32>,
    %c0_95 = arith.constant 0 : index
    %c0_96 = arith.constant 0 : index
    %222 = vector.load %arg11[%c0_95, %c0_96] : memref<8x32xf32, #tpu.memory_space<vmem>>, vector<8x32xf32>
    tpu.vector_store %arg11[%c0_95, %c0_96], %196 {strides = array<i32>} : memref<8x32xf32, #tpu.memory_space<vmem>>, vector<8x32xf32>,
    %c0_97 = arith.constant 0 : index
    %c0_98 = arith.constant 0 : index
    %223 = vector.load %arg12[%c0_97, %c0_98] : memref<8x1xf32, #tpu.memory_space<vmem>>, vector<8x1xf32>
    tpu.vector_store %arg12[%c0_97, %c0_98], %220 {strides = array<i32>} : memref<8x1xf32, #tpu.memory_space<vmem>>, vector<8x1xf32>,
    %c3_99 = arith.constant 3 : index
    %c0_100 = arith.constant 0 : index
    %c0_101 = arith.constant 0 : index
    %224 = vector.load %arg9[%c3_99, %c0_100, %c0_101] : memref<10x8x1xf32, #tpu.memory_space<vmem>>, vector<1x8x1xf32>
    %225 = vector.shape_cast %224 : vector<1x8x1xf32> to vector<8x1xf32>
    %226 = vector.shape_cast %220 : vector<8x1xf32> to vector<1x8x1xf32>
    tpu.vector_store %arg9[%c3_99, %c0_100, %c0_101], %226 {strides = array<i32>} : memref<10x8x1xf32, #tpu.memory_space<vmem>>, vector<1x8x1xf32>,
    %c4 = arith.constant 4 : index
    %c0_102 = arith.constant 0 : index
    %c0_103 = arith.constant 0 : index
    %227 = vector.load %arg1[%c4, %c0_102, %c0_103] : memref<8x8x1xf32, #tpu.memory_space<vmem>>, vector<1x8x1xf32>
    %228 = vector.shape_cast %227 : vector<1x8x1xf32> to vector<8x1xf32>
    %229 = vector.broadcast %228 : vector<8x1xf32> to vector<8x128xf32>
    %230 = arith.mulf %229, %8 : vector<8x128xf32>
    %c0_104 = arith.constant 0 : index
    %c0_105 = arith.constant 0 : index
    %231 = vector.load %arg10[%c0_104, %c0_105] : memref<8x32xf32, #tpu.memory_space<vmem>>, vector<8x32xf32>
    %cst_106 = arith.constant dense<0.000000e+00> : vector<8x128xf32>
    %232 = tpu.matmul %231, %9, %cst_106 {dimension_numbers = #tpu.dot_dimension_numbers<[1], [0], [0], [1], [0, 0, 1, 1], [], []>} : vector<8x32xf32>, vector<32x128xf32>, vector<8x128xf32> -> vector<8x128xf32>
    %233 = arith.addf %230, %232 : vector<8x128xf32>
    %234 = arith.addf %233, %12 : vector<8x128xf32>
    %235 = arith.negf %234 : vector<8x128xf32>
    %236 = math.exp %235 : vector<8x128xf32>
    %cst_107 = arith.constant 1.000000e+00 : f32
    %237 = vector.broadcast %cst_107 : f32 to vector<8x128xf32>
    %238 = arith.addf %237, %236 : vector<8x128xf32>
    %239 = arith.divf %237, %238 : vector<8x128xf32>
    %240 = math.tanh %234 : vector<8x128xf32>
    %241 = vector.extract_strided_slice %239 {offsets = [0, 32], sizes = [8, 32], strides = [1, 1]} : vector<8x128xf32> to vector<8x32xf32>
    %c0_108 = arith.constant 0 : index
    %c0_109 = arith.constant 0 : index
    %242 = vector.load %arg11[%c0_108, %c0_109] : memref<8x32xf32, #tpu.memory_space<vmem>>, vector<8x32xf32>
    %243 = arith.mulf %241, %242 : vector<8x32xf32>
    %244 = vector.extract_strided_slice %239 {offsets = [0, 0], sizes = [8, 32], strides = [1, 1]} : vector<8x128xf32> to vector<8x32xf32>
    %245 = vector.extract_strided_slice %240 {offsets = [0, 64], sizes = [8, 32], strides = [1, 1]} : vector<8x128xf32> to vector<8x32xf32>
    %246 = arith.mulf %244, %245 : vector<8x32xf32>
    %247 = arith.addf %243, %246 : vector<8x32xf32>
    %248 = vector.extract_strided_slice %239 {offsets = [0, 96], sizes = [8, 32], strides = [1, 1]} : vector<8x128xf32> to vector<8x32xf32>
    %249 = math.tanh %247 : vector<8x32xf32>
    %250 = arith.mulf %248, %249 : vector<8x32xf32>
    %cst_110 = arith.constant dense<0.000000e+00> : vector<8x128xf32>
    %251 = tpu.matmul %250, %13, %cst_110 {dimension_numbers = #tpu.dot_dimension_numbers<[1], [0], [0], [1], [0, 0, 1, 1], [], []>} : vector<8x32xf32>, vector<32x128xf32>, vector<8x128xf32> -> vector<8x128xf32>
    %252 = arith.addf %251, %16 : vector<8x128xf32>
    %253 = arith.negf %252 : vector<8x128xf32>
    %254 = math.exp %253 : vector<8x128xf32>
    %cst_111 = arith.constant 1.000000e+00 : f32
    %255 = vector.broadcast %cst_111 : f32 to vector<8x128xf32>
    %256 = arith.addf %255, %254 : vector<8x128xf32>
    %257 = arith.divf %255, %256 : vector<8x128xf32>
    %258 = math.tanh %252 : vector<8x128xf32>
    %259 = vector.extract_strided_slice %257 {offsets = [0, 32], sizes = [8, 32], strides = [1, 1]} : vector<8x128xf32> to vector<8x32xf32>
    %260 = arith.mulf %259, %247 : vector<8x32xf32>
    %261 = vector.extract_strided_slice %257 {offsets = [0, 0], sizes = [8, 32], strides = [1, 1]} : vector<8x128xf32> to vector<8x32xf32>
    %262 = vector.extract_strided_slice %258 {offsets = [0, 64], sizes = [8, 32], strides = [1, 1]} : vector<8x128xf32> to vector<8x32xf32>
    %263 = arith.mulf %261, %262 : vector<8x32xf32>
    %264 = arith.addf %260, %263 : vector<8x32xf32>
    %265 = vector.extract_strided_slice %257 {offsets = [0, 96], sizes = [8, 32], strides = [1, 1]} : vector<8x128xf32> to vector<8x32xf32>
    %266 = math.tanh %264 : vector<8x32xf32>
    %267 = arith.mulf %265, %266 : vector<8x32xf32>
    %268 = arith.mulf %267, %19 : vector<8x32xf32>
    %cst_112 = arith.constant dense<0.000000e+00> : vector<8xf32>
    %269 = vector.multi_reduction <add>, %268, %cst_112 [1] : vector<8x32xf32> to vector<8xf32>
    %270 = vector.shape_cast %269 : vector<8xf32> to vector<8x1xf32>
    %271 = arith.addf %270, %22 : vector<8x1xf32>
    %c0_113 = arith.constant 0 : index
    %c0_114 = arith.constant 0 : index
    %272 = vector.load %arg10[%c0_113, %c0_114] : memref<8x32xf32, #tpu.memory_space<vmem>>, vector<8x32xf32>
    tpu.vector_store %arg10[%c0_113, %c0_114], %250 {strides = array<i32>} : memref<8x32xf32, #tpu.memory_space<vmem>>, vector<8x32xf32>,
    %c0_115 = arith.constant 0 : index
    %c0_116 = arith.constant 0 : index
    %273 = vector.load %arg11[%c0_115, %c0_116] : memref<8x32xf32, #tpu.memory_space<vmem>>, vector<8x32xf32>
    tpu.vector_store %arg11[%c0_115, %c0_116], %247 {strides = array<i32>} : memref<8x32xf32, #tpu.memory_space<vmem>>, vector<8x32xf32>,
    %c0_117 = arith.constant 0 : index
    %c0_118 = arith.constant 0 : index
    %274 = vector.load %arg12[%c0_117, %c0_118] : memref<8x1xf32, #tpu.memory_space<vmem>>, vector<8x1xf32>
    tpu.vector_store %arg12[%c0_117, %c0_118], %271 {strides = array<i32>} : memref<8x1xf32, #tpu.memory_space<vmem>>, vector<8x1xf32>,
    %c4_119 = arith.constant 4 : index
    %c0_120 = arith.constant 0 : index
    %c0_121 = arith.constant 0 : index
    %275 = vector.load %arg9[%c4_119, %c0_120, %c0_121] : memref<10x8x1xf32, #tpu.memory_space<vmem>>, vector<1x8x1xf32>
    %276 = vector.shape_cast %275 : vector<1x8x1xf32> to vector<8x1xf32>
    %277 = vector.shape_cast %271 : vector<8x1xf32> to vector<1x8x1xf32>
    tpu.vector_store %arg9[%c4_119, %c0_120, %c0_121], %277 {strides = array<i32>} : memref<10x8x1xf32, #tpu.memory_space<vmem>>, vector<1x8x1xf32>,
    %c5 = arith.constant 5 : index
    %c0_122 = arith.constant 0 : index
    %c0_123 = arith.constant 0 : index
    %278 = vector.load %arg1[%c5, %c0_122, %c0_123] : memref<8x8x1xf32, #tpu.memory_space<vmem>>, vector<1x8x1xf32>
    %279 = vector.shape_cast %278 : vector<1x8x1xf32> to vector<8x1xf32>
    %280 = vector.broadcast %279 : vector<8x1xf32> to vector<8x128xf32>
    %281 = arith.mulf %280, %8 : vector<8x128xf32>
    %c0_124 = arith.constant 0 : index
    %c0_125 = arith.constant 0 : index
    %282 = vector.load %arg10[%c0_124, %c0_125] : memref<8x32xf32, #tpu.memory_space<vmem>>, vector<8x32xf32>
    %cst_126 = arith.constant dense<0.000000e+00> : vector<8x128xf32>
    %283 = tpu.matmul %282, %9, %cst_126 {dimension_numbers = #tpu.dot_dimension_numbers<[1], [0], [0], [1], [0, 0, 1, 1], [], []>} : vector<8x32xf32>, vector<32x128xf32>, vector<8x128xf32> -> vector<8x128xf32>
    %284 = arith.addf %281, %283 : vector<8x128xf32>
    %285 = arith.addf %284, %12 : vector<8x128xf32>
    %286 = arith.negf %285 : vector<8x128xf32>
    %287 = math.exp %286 : vector<8x128xf32>
    %cst_127 = arith.constant 1.000000e+00 : f32
    %288 = vector.broadcast %cst_127 : f32 to vector<8x128xf32>
    %289 = arith.addf %288, %287 : vector<8x128xf32>
    %290 = arith.divf %288, %289 : vector<8x128xf32>
    %291 = math.tanh %285 : vector<8x128xf32>
    %292 = vector.extract_strided_slice %290 {offsets = [0, 32], sizes = [8, 32], strides = [1, 1]} : vector<8x128xf32> to vector<8x32xf32>
    %c0_128 = arith.constant 0 : index
    %c0_129 = arith.constant 0 : index
    %293 = vector.load %arg11[%c0_128, %c0_129] : memref<8x32xf32, #tpu.memory_space<vmem>>, vector<8x32xf32>
    %294 = arith.mulf %292, %293 : vector<8x32xf32>
    %295 = vector.extract_strided_slice %290 {offsets = [0, 0], sizes = [8, 32], strides = [1, 1]} : vector<8x128xf32> to vector<8x32xf32>
    %296 = vector.extract_strided_slice %291 {offsets = [0, 64], sizes = [8, 32], strides = [1, 1]} : vector<8x128xf32> to vector<8x32xf32>
    %297 = arith.mulf %295, %296 : vector<8x32xf32>
    %298 = arith.addf %294, %297 : vector<8x32xf32>
    %299 = vector.extract_strided_slice %290 {offsets = [0, 96], sizes = [8, 32], strides = [1, 1]} : vector<8x128xf32> to vector<8x32xf32>
    %300 = math.tanh %298 : vector<8x32xf32>
    %301 = arith.mulf %299, %300 : vector<8x32xf32>
    %cst_130 = arith.constant dense<0.000000e+00> : vector<8x128xf32>
    %302 = tpu.matmul %301, %13, %cst_130 {dimension_numbers = #tpu.dot_dimension_numbers<[1], [0], [0], [1], [0, 0, 1, 1], [], []>} : vector<8x32xf32>, vector<32x128xf32>, vector<8x128xf32> -> vector<8x128xf32>
    %303 = arith.addf %302, %16 : vector<8x128xf32>
    %304 = arith.negf %303 : vector<8x128xf32>
    %305 = math.exp %304 : vector<8x128xf32>
    %cst_131 = arith.constant 1.000000e+00 : f32
    %306 = vector.broadcast %cst_131 : f32 to vector<8x128xf32>
    %307 = arith.addf %306, %305 : vector<8x128xf32>
    %308 = arith.divf %306, %307 : vector<8x128xf32>
    %309 = math.tanh %303 : vector<8x128xf32>
    %310 = vector.extract_strided_slice %308 {offsets = [0, 32], sizes = [8, 32], strides = [1, 1]} : vector<8x128xf32> to vector<8x32xf32>
    %311 = arith.mulf %310, %298 : vector<8x32xf32>
    %312 = vector.extract_strided_slice %308 {offsets = [0, 0], sizes = [8, 32], strides = [1, 1]} : vector<8x128xf32> to vector<8x32xf32>
    %313 = vector.extract_strided_slice %309 {offsets = [0, 64], sizes = [8, 32], strides = [1, 1]} : vector<8x128xf32> to vector<8x32xf32>
    %314 = arith.mulf %312, %313 : vector<8x32xf32>
    %315 = arith.addf %311, %314 : vector<8x32xf32>
    %316 = vector.extract_strided_slice %308 {offsets = [0, 96], sizes = [8, 32], strides = [1, 1]} : vector<8x128xf32> to vector<8x32xf32>
    %317 = math.tanh %315 : vector<8x32xf32>
    %318 = arith.mulf %316, %317 : vector<8x32xf32>
    %319 = arith.mulf %318, %19 : vector<8x32xf32>
    %cst_132 = arith.constant dense<0.000000e+00> : vector<8xf32>
    %320 = vector.multi_reduction <add>, %319, %cst_132 [1] : vector<8x32xf32> to vector<8xf32>
    %321 = vector.shape_cast %320 : vector<8xf32> to vector<8x1xf32>
    %322 = arith.addf %321, %22 : vector<8x1xf32>
    %c0_133 = arith.constant 0 : index
    %c0_134 = arith.constant 0 : index
    %323 = vector.load %arg10[%c0_133, %c0_134] : memref<8x32xf32, #tpu.memory_space<vmem>>, vector<8x32xf32>
    tpu.vector_store %arg10[%c0_133, %c0_134], %301 {strides = array<i32>} : memref<8x32xf32, #tpu.memory_space<vmem>>, vector<8x32xf32>,
    %c0_135 = arith.constant 0 : index
    %c0_136 = arith.constant 0 : index
    %324 = vector.load %arg11[%c0_135, %c0_136] : memref<8x32xf32, #tpu.memory_space<vmem>>, vector<8x32xf32>
    tpu.vector_store %arg11[%c0_135, %c0_136], %298 {strides = array<i32>} : memref<8x32xf32, #tpu.memory_space<vmem>>, vector<8x32xf32>,
    %c0_137 = arith.constant 0 : index
    %c0_138 = arith.constant 0 : index
    %325 = vector.load %arg12[%c0_137, %c0_138] : memref<8x1xf32, #tpu.memory_space<vmem>>, vector<8x1xf32>
    tpu.vector_store %arg12[%c0_137, %c0_138], %322 {strides = array<i32>} : memref<8x1xf32, #tpu.memory_space<vmem>>, vector<8x1xf32>,
    %c5_139 = arith.constant 5 : index
    %c0_140 = arith.constant 0 : index
    %c0_141 = arith.constant 0 : index
    %326 = vector.load %arg9[%c5_139, %c0_140, %c0_141] : memref<10x8x1xf32, #tpu.memory_space<vmem>>, vector<1x8x1xf32>
    %327 = vector.shape_cast %326 : vector<1x8x1xf32> to vector<8x1xf32>
    %328 = vector.shape_cast %322 : vector<8x1xf32> to vector<1x8x1xf32>
    tpu.vector_store %arg9[%c5_139, %c0_140, %c0_141], %328 {strides = array<i32>} : memref<10x8x1xf32, #tpu.memory_space<vmem>>, vector<1x8x1xf32>,
    %c6 = arith.constant 6 : index
    %c0_142 = arith.constant 0 : index
    %c0_143 = arith.constant 0 : index
    %329 = vector.load %arg1[%c6, %c0_142, %c0_143] : memref<8x8x1xf32, #tpu.memory_space<vmem>>, vector<1x8x1xf32>
    %330 = vector.shape_cast %329 : vector<1x8x1xf32> to vector<8x1xf32>
    %331 = vector.broadcast %330 : vector<8x1xf32> to vector<8x128xf32>
    %332 = arith.mulf %331, %8 : vector<8x128xf32>
    %c0_144 = arith.constant 0 : index
    %c0_145 = arith.constant 0 : index
    %333 = vector.load %arg10[%c0_144, %c0_145] : memref<8x32xf32, #tpu.memory_space<vmem>>, vector<8x32xf32>
    %cst_146 = arith.constant dense<0.000000e+00> : vector<8x128xf32>
    %334 = tpu.matmul %333, %9, %cst_146 {dimension_numbers = #tpu.dot_dimension_numbers<[1], [0], [0], [1], [0, 0, 1, 1], [], []>} : vector<8x32xf32>, vector<32x128xf32>, vector<8x128xf32> -> vector<8x128xf32>
    %335 = arith.addf %332, %334 : vector<8x128xf32>
    %336 = arith.addf %335, %12 : vector<8x128xf32>
    %337 = arith.negf %336 : vector<8x128xf32>
    %338 = math.exp %337 : vector<8x128xf32>
    %cst_147 = arith.constant 1.000000e+00 : f32
    %339 = vector.broadcast %cst_147 : f32 to vector<8x128xf32>
    %340 = arith.addf %339, %338 : vector<8x128xf32>
    %341 = arith.divf %339, %340 : vector<8x128xf32>
    %342 = math.tanh %336 : vector<8x128xf32>
    %343 = vector.extract_strided_slice %341 {offsets = [0, 32], sizes = [8, 32], strides = [1, 1]} : vector<8x128xf32> to vector<8x32xf32>
    %c0_148 = arith.constant 0 : index
    %c0_149 = arith.constant 0 : index
    %344 = vector.load %arg11[%c0_148, %c0_149] : memref<8x32xf32, #tpu.memory_space<vmem>>, vector<8x32xf32>
    %345 = arith.mulf %343, %344 : vector<8x32xf32>
    %346 = vector.extract_strided_slice %341 {offsets = [0, 0], sizes = [8, 32], strides = [1, 1]} : vector<8x128xf32> to vector<8x32xf32>
    %347 = vector.extract_strided_slice %342 {offsets = [0, 64], sizes = [8, 32], strides = [1, 1]} : vector<8x128xf32> to vector<8x32xf32>
    %348 = arith.mulf %346, %347 : vector<8x32xf32>
    %349 = arith.addf %345, %348 : vector<8x32xf32>
    %350 = vector.extract_strided_slice %341 {offsets = [0, 96], sizes = [8, 32], strides = [1, 1]} : vector<8x128xf32> to vector<8x32xf32>
    %351 = math.tanh %349 : vector<8x32xf32>
    %352 = arith.mulf %350, %351 : vector<8x32xf32>
    %cst_150 = arith.constant dense<0.000000e+00> : vector<8x128xf32>
    %353 = tpu.matmul %352, %13, %cst_150 {dimension_numbers = #tpu.dot_dimension_numbers<[1], [0], [0], [1], [0, 0, 1, 1], [], []>} : vector<8x32xf32>, vector<32x128xf32>, vector<8x128xf32> -> vector<8x128xf32>
    %354 = arith.addf %353, %16 : vector<8x128xf32>
    %355 = arith.negf %354 : vector<8x128xf32>
    %356 = math.exp %355 : vector<8x128xf32>
    %cst_151 = arith.constant 1.000000e+00 : f32
    %357 = vector.broadcast %cst_151 : f32 to vector<8x128xf32>
    %358 = arith.addf %357, %356 : vector<8x128xf32>
    %359 = arith.divf %357, %358 : vector<8x128xf32>
    %360 = math.tanh %354 : vector<8x128xf32>
    %361 = vector.extract_strided_slice %359 {offsets = [0, 32], sizes = [8, 32], strides = [1, 1]} : vector<8x128xf32> to vector<8x32xf32>
    %362 = arith.mulf %361, %349 : vector<8x32xf32>
    %363 = vector.extract_strided_slice %359 {offsets = [0, 0], sizes = [8, 32], strides = [1, 1]} : vector<8x128xf32> to vector<8x32xf32>
    %364 = vector.extract_strided_slice %360 {offsets = [0, 64], sizes = [8, 32], strides = [1, 1]} : vector<8x128xf32> to vector<8x32xf32>
    %365 = arith.mulf %363, %364 : vector<8x32xf32>
    %366 = arith.addf %362, %365 : vector<8x32xf32>
    %367 = vector.extract_strided_slice %359 {offsets = [0, 96], sizes = [8, 32], strides = [1, 1]} : vector<8x128xf32> to vector<8x32xf32>
    %368 = math.tanh %366 : vector<8x32xf32>
    %369 = arith.mulf %367, %368 : vector<8x32xf32>
    %370 = arith.mulf %369, %19 : vector<8x32xf32>
    %cst_152 = arith.constant dense<0.000000e+00> : vector<8xf32>
    %371 = vector.multi_reduction <add>, %370, %cst_152 [1] : vector<8x32xf32> to vector<8xf32>
    %372 = vector.shape_cast %371 : vector<8xf32> to vector<8x1xf32>
    %373 = arith.addf %372, %22 : vector<8x1xf32>
    %c0_153 = arith.constant 0 : index
    %c0_154 = arith.constant 0 : index
    %374 = vector.load %arg10[%c0_153, %c0_154] : memref<8x32xf32, #tpu.memory_space<vmem>>, vector<8x32xf32>
    tpu.vector_store %arg10[%c0_153, %c0_154], %352 {strides = array<i32>} : memref<8x32xf32, #tpu.memory_space<vmem>>, vector<8x32xf32>,
    %c0_155 = arith.constant 0 : index
    %c0_156 = arith.constant 0 : index
    %375 = vector.load %arg11[%c0_155, %c0_156] : memref<8x32xf32, #tpu.memory_space<vmem>>, vector<8x32xf32>
    tpu.vector_store %arg11[%c0_155, %c0_156], %349 {strides = array<i32>} : memref<8x32xf32, #tpu.memory_space<vmem>>, vector<8x32xf32>,
    %c0_157 = arith.constant 0 : index
    %c0_158 = arith.constant 0 : index
    %376 = vector.load %arg12[%c0_157, %c0_158] : memref<8x1xf32, #tpu.memory_space<vmem>>, vector<8x1xf32>
    tpu.vector_store %arg12[%c0_157, %c0_158], %373 {strides = array<i32>} : memref<8x1xf32, #tpu.memory_space<vmem>>, vector<8x1xf32>,
    %c6_159 = arith.constant 6 : index
    %c0_160 = arith.constant 0 : index
    %c0_161 = arith.constant 0 : index
    %377 = vector.load %arg9[%c6_159, %c0_160, %c0_161] : memref<10x8x1xf32, #tpu.memory_space<vmem>>, vector<1x8x1xf32>
    %378 = vector.shape_cast %377 : vector<1x8x1xf32> to vector<8x1xf32>
    %379 = vector.shape_cast %373 : vector<8x1xf32> to vector<1x8x1xf32>
    tpu.vector_store %arg9[%c6_159, %c0_160, %c0_161], %379 {strides = array<i32>} : memref<10x8x1xf32, #tpu.memory_space<vmem>>, vector<1x8x1xf32>,
    %c7 = arith.constant 7 : index
    %c0_162 = arith.constant 0 : index
    %c0_163 = arith.constant 0 : index
    %380 = vector.load %arg1[%c7, %c0_162, %c0_163] : memref<8x8x1xf32, #tpu.memory_space<vmem>>, vector<1x8x1xf32>
    %381 = vector.shape_cast %380 : vector<1x8x1xf32> to vector<8x1xf32>
    %382 = vector.broadcast %381 : vector<8x1xf32> to vector<8x128xf32>
    %383 = arith.mulf %382, %8 : vector<8x128xf32>
    %c0_164 = arith.constant 0 : index
    %c0_165 = arith.constant 0 : index
    %384 = vector.load %arg10[%c0_164, %c0_165] : memref<8x32xf32, #tpu.memory_space<vmem>>, vector<8x32xf32>
    %cst_166 = arith.constant dense<0.000000e+00> : vector<8x128xf32>
    %385 = tpu.matmul %384, %9, %cst_166 {dimension_numbers = #tpu.dot_dimension_numbers<[1], [0], [0], [1], [0, 0, 1, 1], [], []>} : vector<8x32xf32>, vector<32x128xf32>, vector<8x128xf32> -> vector<8x128xf32>
    %386 = arith.addf %383, %385 : vector<8x128xf32>
    %387 = arith.addf %386, %12 : vector<8x128xf32>
    %388 = arith.negf %387 : vector<8x128xf32>
    %389 = math.exp %388 : vector<8x128xf32>
    %cst_167 = arith.constant 1.000000e+00 : f32
    %390 = vector.broadcast %cst_167 : f32 to vector<8x128xf32>
    %391 = arith.addf %390, %389 : vector<8x128xf32>
    %392 = arith.divf %390, %391 : vector<8x128xf32>
    %393 = math.tanh %387 : vector<8x128xf32>
    %394 = vector.extract_strided_slice %392 {offsets = [0, 32], sizes = [8, 32], strides = [1, 1]} : vector<8x128xf32> to vector<8x32xf32>
    %c0_168 = arith.constant 0 : index
    %c0_169 = arith.constant 0 : index
    %395 = vector.load %arg11[%c0_168, %c0_169] : memref<8x32xf32, #tpu.memory_space<vmem>>, vector<8x32xf32>
    %396 = arith.mulf %394, %395 : vector<8x32xf32>
    %397 = vector.extract_strided_slice %392 {offsets = [0, 0], sizes = [8, 32], strides = [1, 1]} : vector<8x128xf32> to vector<8x32xf32>
    %398 = vector.extract_strided_slice %393 {offsets = [0, 64], sizes = [8, 32], strides = [1, 1]} : vector<8x128xf32> to vector<8x32xf32>
    %399 = arith.mulf %397, %398 : vector<8x32xf32>
    %400 = arith.addf %396, %399 : vector<8x32xf32>
    %401 = vector.extract_strided_slice %392 {offsets = [0, 96], sizes = [8, 32], strides = [1, 1]} : vector<8x128xf32> to vector<8x32xf32>
    %402 = math.tanh %400 : vector<8x32xf32>
    %403 = arith.mulf %401, %402 : vector<8x32xf32>
    %cst_170 = arith.constant dense<0.000000e+00> : vector<8x128xf32>
    %404 = tpu.matmul %403, %13, %cst_170 {dimension_numbers = #tpu.dot_dimension_numbers<[1], [0], [0], [1], [0, 0, 1, 1], [], []>} : vector<8x32xf32>, vector<32x128xf32>, vector<8x128xf32> -> vector<8x128xf32>
    %405 = arith.addf %404, %16 : vector<8x128xf32>
    %406 = arith.negf %405 : vector<8x128xf32>
    %407 = math.exp %406 : vector<8x128xf32>
    %cst_171 = arith.constant 1.000000e+00 : f32
    %408 = vector.broadcast %cst_171 : f32 to vector<8x128xf32>
    %409 = arith.addf %408, %407 : vector<8x128xf32>
    %410 = arith.divf %408, %409 : vector<8x128xf32>
    %411 = math.tanh %405 : vector<8x128xf32>
    %412 = vector.extract_strided_slice %410 {offsets = [0, 32], sizes = [8, 32], strides = [1, 1]} : vector<8x128xf32> to vector<8x32xf32>
    %413 = arith.mulf %412, %400 : vector<8x32xf32>
    %414 = vector.extract_strided_slice %410 {offsets = [0, 0], sizes = [8, 32], strides = [1, 1]} : vector<8x128xf32> to vector<8x32xf32>
    %415 = vector.extract_strided_slice %411 {offsets = [0, 64], sizes = [8, 32], strides = [1, 1]} : vector<8x128xf32> to vector<8x32xf32>
    %416 = arith.mulf %414, %415 : vector<8x32xf32>
    %417 = arith.addf %413, %416 : vector<8x32xf32>
    %418 = vector.extract_strided_slice %410 {offsets = [0, 96], sizes = [8, 32], strides = [1, 1]} : vector<8x128xf32> to vector<8x32xf32>
    %419 = math.tanh %417 : vector<8x32xf32>
    %420 = arith.mulf %418, %419 : vector<8x32xf32>
    %421 = arith.mulf %420, %19 : vector<8x32xf32>
    %cst_172 = arith.constant dense<0.000000e+00> : vector<8xf32>
    %422 = vector.multi_reduction <add>, %421, %cst_172 [1] : vector<8x32xf32> to vector<8xf32>
    %423 = vector.shape_cast %422 : vector<8xf32> to vector<8x1xf32>
    %424 = arith.addf %423, %22 : vector<8x1xf32>
    %c0_173 = arith.constant 0 : index
    %c0_174 = arith.constant 0 : index
    %425 = vector.load %arg10[%c0_173, %c0_174] : memref<8x32xf32, #tpu.memory_space<vmem>>, vector<8x32xf32>
    tpu.vector_store %arg10[%c0_173, %c0_174], %403 {strides = array<i32>} : memref<8x32xf32, #tpu.memory_space<vmem>>, vector<8x32xf32>,
    %c0_175 = arith.constant 0 : index
    %c0_176 = arith.constant 0 : index
    %426 = vector.load %arg11[%c0_175, %c0_176] : memref<8x32xf32, #tpu.memory_space<vmem>>, vector<8x32xf32>
    tpu.vector_store %arg11[%c0_175, %c0_176], %400 {strides = array<i32>} : memref<8x32xf32, #tpu.memory_space<vmem>>, vector<8x32xf32>,
    %c0_177 = arith.constant 0 : index
    %c0_178 = arith.constant 0 : index
    %427 = vector.load %arg12[%c0_177, %c0_178] : memref<8x1xf32, #tpu.memory_space<vmem>>, vector<8x1xf32>
    tpu.vector_store %arg12[%c0_177, %c0_178], %424 {strides = array<i32>} : memref<8x1xf32, #tpu.memory_space<vmem>>, vector<8x1xf32>,
    %c7_179 = arith.constant 7 : index
    %c0_180 = arith.constant 0 : index
    %c0_181 = arith.constant 0 : index
    %428 = vector.load %arg9[%c7_179, %c0_180, %c0_181] : memref<10x8x1xf32, #tpu.memory_space<vmem>>, vector<1x8x1xf32>
    %429 = vector.shape_cast %428 : vector<1x8x1xf32> to vector<8x1xf32>
    %430 = vector.shape_cast %424 : vector<8x1xf32> to vector<1x8x1xf32>
    tpu.vector_store %arg9[%c7_179, %c0_180, %c0_181], %430 {strides = array<i32>} : memref<10x8x1xf32, #tpu.memory_space<vmem>>, vector<1x8x1xf32>,
    %c0_182 = arith.constant 0 : index
    %c0_183 = arith.constant 0 : index
    %431 = vector.load %arg12[%c0_182, %c0_183] : memref<8x1xf32, #tpu.memory_space<vmem>>, vector<8x1xf32>
    %432 = vector.broadcast %431 : vector<8x1xf32> to vector<8x128xf32>
    %433 = arith.mulf %432, %8 : vector<8x128xf32>
    %c0_184 = arith.constant 0 : index
    %c0_185 = arith.constant 0 : index
    %434 = vector.load %arg10[%c0_184, %c0_185] : memref<8x32xf32, #tpu.memory_space<vmem>>, vector<8x32xf32>
    %cst_186 = arith.constant dense<0.000000e+00> : vector<8x128xf32>
    %435 = tpu.matmul %434, %9, %cst_186 {dimension_numbers = #tpu.dot_dimension_numbers<[1], [0], [0], [1], [0, 0, 1, 1], [], []>} : vector<8x32xf32>, vector<32x128xf32>, vector<8x128xf32> -> vector<8x128xf32>
    %436 = arith.addf %433, %435 : vector<8x128xf32>
    %437 = arith.addf %436, %12 : vector<8x128xf32>
    %438 = arith.negf %437 : vector<8x128xf32>
    %439 = math.exp %438 : vector<8x128xf32>
    %cst_187 = arith.constant 1.000000e+00 : f32
    %440 = vector.broadcast %cst_187 : f32 to vector<8x128xf32>
    %441 = arith.addf %440, %439 : vector<8x128xf32>
    %442 = arith.divf %440, %441 : vector<8x128xf32>
    %443 = math.tanh %437 : vector<8x128xf32>
    %444 = vector.extract_strided_slice %442 {offsets = [0, 32], sizes = [8, 32], strides = [1, 1]} : vector<8x128xf32> to vector<8x32xf32>
    %c0_188 = arith.constant 0 : index
    %c0_189 = arith.constant 0 : index
    %445 = vector.load %arg11[%c0_188, %c0_189] : memref<8x32xf32, #tpu.memory_space<vmem>>, vector<8x32xf32>
    %446 = arith.mulf %444, %445 : vector<8x32xf32>
    %447 = vector.extract_strided_slice %442 {offsets = [0, 0], sizes = [8, 32], strides = [1, 1]} : vector<8x128xf32> to vector<8x32xf32>
    %448 = vector.extract_strided_slice %443 {offsets = [0, 64], sizes = [8, 32], strides = [1, 1]} : vector<8x128xf32> to vector<8x32xf32>
    %449 = arith.mulf %447, %448 : vector<8x32xf32>
    %450 = arith.addf %446, %449 : vector<8x32xf32>
    %451 = vector.extract_strided_slice %442 {offsets = [0, 96], sizes = [8, 32], strides = [1, 1]} : vector<8x128xf32> to vector<8x32xf32>
    %452 = math.tanh %450 : vector<8x32xf32>
    %453 = arith.mulf %451, %452 : vector<8x32xf32>
    %cst_190 = arith.constant dense<0.000000e+00> : vector<8x128xf32>
    %454 = tpu.matmul %453, %13, %cst_190 {dimension_numbers = #tpu.dot_dimension_numbers<[1], [0], [0], [1], [0, 0, 1, 1], [], []>} : vector<8x32xf32>, vector<32x128xf32>, vector<8x128xf32> -> vector<8x128xf32>
    %455 = arith.addf %454, %16 : vector<8x128xf32>
    %456 = arith.negf %455 : vector<8x128xf32>
    %457 = math.exp %456 : vector<8x128xf32>
    %cst_191 = arith.constant 1.000000e+00 : f32
    %458 = vector.broadcast %cst_191 : f32 to vector<8x128xf32>
    %459 = arith.addf %458, %457 : vector<8x128xf32>
    %460 = arith.divf %458, %459 : vector<8x128xf32>
    %461 = math.tanh %455 : vector<8x128xf32>
    %462 = vector.extract_strided_slice %460 {offsets = [0, 32], sizes = [8, 32], strides = [1, 1]} : vector<8x128xf32> to vector<8x32xf32>
    %463 = arith.mulf %462, %450 : vector<8x32xf32>
    %464 = vector.extract_strided_slice %460 {offsets = [0, 0], sizes = [8, 32], strides = [1, 1]} : vector<8x128xf32> to vector<8x32xf32>
    %465 = vector.extract_strided_slice %461 {offsets = [0, 64], sizes = [8, 32], strides = [1, 1]} : vector<8x128xf32> to vector<8x32xf32>
    %466 = arith.mulf %464, %465 : vector<8x32xf32>
    %467 = arith.addf %463, %466 : vector<8x32xf32>
    %468 = vector.extract_strided_slice %460 {offsets = [0, 96], sizes = [8, 32], strides = [1, 1]} : vector<8x128xf32> to vector<8x32xf32>
    %469 = math.tanh %467 : vector<8x32xf32>
    %470 = arith.mulf %468, %469 : vector<8x32xf32>
    %471 = arith.mulf %470, %19 : vector<8x32xf32>
    %cst_192 = arith.constant dense<0.000000e+00> : vector<8xf32>
    %472 = vector.multi_reduction <add>, %471, %cst_192 [1] : vector<8x32xf32> to vector<8xf32>
    %473 = vector.shape_cast %472 : vector<8xf32> to vector<8x1xf32>
    %474 = arith.addf %473, %22 : vector<8x1xf32>
    %c0_193 = arith.constant 0 : index
    %c0_194 = arith.constant 0 : index
    %475 = vector.load %arg10[%c0_193, %c0_194] : memref<8x32xf32, #tpu.memory_space<vmem>>, vector<8x32xf32>
    tpu.vector_store %arg10[%c0_193, %c0_194], %453 {strides = array<i32>} : memref<8x32xf32, #tpu.memory_space<vmem>>, vector<8x32xf32>,
    %c0_195 = arith.constant 0 : index
    %c0_196 = arith.constant 0 : index
    %476 = vector.load %arg11[%c0_195, %c0_196] : memref<8x32xf32, #tpu.memory_space<vmem>>, vector<8x32xf32>
    tpu.vector_store %arg11[%c0_195, %c0_196], %450 {strides = array<i32>} : memref<8x32xf32, #tpu.memory_space<vmem>>, vector<8x32xf32>,
    %c0_197 = arith.constant 0 : index
    %c0_198 = arith.constant 0 : index
    %477 = vector.load %arg12[%c0_197, %c0_198] : memref<8x1xf32, #tpu.memory_space<vmem>>, vector<8x1xf32>
    tpu.vector_store %arg12[%c0_197, %c0_198], %474 {strides = array<i32>} : memref<8x1xf32, #tpu.memory_space<vmem>>, vector<8x1xf32>,
    %c8 = arith.constant 8 : index
    %c0_199 = arith.constant 0 : index
    %c0_200 = arith.constant 0 : index
    %478 = vector.load %arg9[%c8, %c0_199, %c0_200] : memref<10x8x1xf32, #tpu.memory_space<vmem>>, vector<1x8x1xf32>
    %479 = vector.shape_cast %478 : vector<1x8x1xf32> to vector<8x1xf32>
    %480 = vector.shape_cast %474 : vector<8x1xf32> to vector<1x8x1xf32>
    tpu.vector_store %arg9[%c8, %c0_199, %c0_200], %480 {strides = array<i32>} : memref<10x8x1xf32, #tpu.memory_space<vmem>>, vector<1x8x1xf32>,
    %c0_201 = arith.constant 0 : index
    %c0_202 = arith.constant 0 : index
    %481 = vector.load %arg12[%c0_201, %c0_202] : memref<8x1xf32, #tpu.memory_space<vmem>>, vector<8x1xf32>
    %482 = vector.broadcast %481 : vector<8x1xf32> to vector<8x128xf32>
    %483 = arith.mulf %482, %8 : vector<8x128xf32>
    %c0_203 = arith.constant 0 : index
    %c0_204 = arith.constant 0 : index
    %484 = vector.load %arg10[%c0_203, %c0_204] : memref<8x32xf32, #tpu.memory_space<vmem>>, vector<8x32xf32>
    %cst_205 = arith.constant dense<0.000000e+00> : vector<8x128xf32>
    %485 = tpu.matmul %484, %9, %cst_205 {dimension_numbers = #tpu.dot_dimension_numbers<[1], [0], [0], [1], [0, 0, 1, 1], [], []>} : vector<8x32xf32>, vector<32x128xf32>, vector<8x128xf32> -> vector<8x128xf32>
    %486 = arith.addf %483, %485 : vector<8x128xf32>
    %487 = arith.addf %486, %12 : vector<8x128xf32>
    %488 = arith.negf %487 : vector<8x128xf32>
    %489 = math.exp %488 : vector<8x128xf32>
    %cst_206 = arith.constant 1.000000e+00 : f32
    %490 = vector.broadcast %cst_206 : f32 to vector<8x128xf32>
    %491 = arith.addf %490, %489 : vector<8x128xf32>
    %492 = arith.divf %490, %491 : vector<8x128xf32>
    %493 = math.tanh %487 : vector<8x128xf32>
    %494 = vector.extract_strided_slice %492 {offsets = [0, 32], sizes = [8, 32], strides = [1, 1]} : vector<8x128xf32> to vector<8x32xf32>
    %c0_207 = arith.constant 0 : index
    %c0_208 = arith.constant 0 : index
    %495 = vector.load %arg11[%c0_207, %c0_208] : memref<8x32xf32, #tpu.memory_space<vmem>>, vector<8x32xf32>
    %496 = arith.mulf %494, %495 : vector<8x32xf32>
    %497 = vector.extract_strided_slice %492 {offsets = [0, 0], sizes = [8, 32], strides = [1, 1]} : vector<8x128xf32> to vector<8x32xf32>
    %498 = vector.extract_strided_slice %493 {offsets = [0, 64], sizes = [8, 32], strides = [1, 1]} : vector<8x128xf32> to vector<8x32xf32>
    %499 = arith.mulf %497, %498 : vector<8x32xf32>
    %500 = arith.addf %496, %499 : vector<8x32xf32>
    %501 = vector.extract_strided_slice %492 {offsets = [0, 96], sizes = [8, 32], strides = [1, 1]} : vector<8x128xf32> to vector<8x32xf32>
    %502 = math.tanh %500 : vector<8x32xf32>
    %503 = arith.mulf %501, %502 : vector<8x32xf32>
    %cst_209 = arith.constant dense<0.000000e+00> : vector<8x128xf32>
    %504 = tpu.matmul %503, %13, %cst_209 {dimension_numbers = #tpu.dot_dimension_numbers<[1], [0], [0], [1], [0, 0, 1, 1], [], []>} : vector<8x32xf32>, vector<32x128xf32>, vector<8x128xf32> -> vector<8x128xf32>
    %505 = arith.addf %504, %16 : vector<8x128xf32>
    %506 = arith.negf %505 : vector<8x128xf32>
    %507 = math.exp %506 : vector<8x128xf32>
    %cst_210 = arith.constant 1.000000e+00 : f32
    %508 = vector.broadcast %cst_210 : f32 to vector<8x128xf32>
    %509 = arith.addf %508, %507 : vector<8x128xf32>
    %510 = arith.divf %508, %509 : vector<8x128xf32>
    %511 = math.tanh %505 : vector<8x128xf32>
    %512 = vector.extract_strided_slice %510 {offsets = [0, 32], sizes = [8, 32], strides = [1, 1]} : vector<8x128xf32> to vector<8x32xf32>
    %513 = arith.mulf %512, %500 : vector<8x32xf32>
    %514 = vector.extract_strided_slice %510 {offsets = [0, 0], sizes = [8, 32], strides = [1, 1]} : vector<8x128xf32> to vector<8x32xf32>
    %515 = vector.extract_strided_slice %511 {offsets = [0, 64], sizes = [8, 32], strides = [1, 1]} : vector<8x128xf32> to vector<8x32xf32>
    %516 = arith.mulf %514, %515 : vector<8x32xf32>
    %517 = arith.addf %513, %516 : vector<8x32xf32>
    %518 = vector.extract_strided_slice %510 {offsets = [0, 96], sizes = [8, 32], strides = [1, 1]} : vector<8x128xf32> to vector<8x32xf32>
    %519 = math.tanh %517 : vector<8x32xf32>
    %520 = arith.mulf %518, %519 : vector<8x32xf32>
    %521 = arith.mulf %520, %19 : vector<8x32xf32>
    %cst_211 = arith.constant dense<0.000000e+00> : vector<8xf32>
    %522 = vector.multi_reduction <add>, %521, %cst_211 [1] : vector<8x32xf32> to vector<8xf32>
    %523 = vector.shape_cast %522 : vector<8xf32> to vector<8x1xf32>
    %524 = arith.addf %523, %22 : vector<8x1xf32>
    %c0_212 = arith.constant 0 : index
    %c0_213 = arith.constant 0 : index
    %525 = vector.load %arg10[%c0_212, %c0_213] : memref<8x32xf32, #tpu.memory_space<vmem>>, vector<8x32xf32>
    tpu.vector_store %arg10[%c0_212, %c0_213], %503 {strides = array<i32>} : memref<8x32xf32, #tpu.memory_space<vmem>>, vector<8x32xf32>,
    %c0_214 = arith.constant 0 : index
    %c0_215 = arith.constant 0 : index
    %526 = vector.load %arg11[%c0_214, %c0_215] : memref<8x32xf32, #tpu.memory_space<vmem>>, vector<8x32xf32>
    tpu.vector_store %arg11[%c0_214, %c0_215], %500 {strides = array<i32>} : memref<8x32xf32, #tpu.memory_space<vmem>>, vector<8x32xf32>,
    %c0_216 = arith.constant 0 : index
    %c0_217 = arith.constant 0 : index
    %527 = vector.load %arg12[%c0_216, %c0_217] : memref<8x1xf32, #tpu.memory_space<vmem>>, vector<8x1xf32>
    tpu.vector_store %arg12[%c0_216, %c0_217], %524 {strides = array<i32>} : memref<8x1xf32, #tpu.memory_space<vmem>>, vector<8x1xf32>,
    %c9 = arith.constant 9 : index
    %c0_218 = arith.constant 0 : index
    %c0_219 = arith.constant 0 : index
    %528 = vector.load %arg9[%c9, %c0_218, %c0_219] : memref<10x8x1xf32, #tpu.memory_space<vmem>>, vector<1x8x1xf32>
    %529 = vector.shape_cast %528 : vector<1x8x1xf32> to vector<8x1xf32>
    %530 = vector.shape_cast %524 : vector<8x1xf32> to vector<1x8x1xf32>
    tpu.vector_store %arg9[%c9, %c0_218, %c0_219], %530 {strides = array<i32>} : memref<10x8x1xf32, #tpu.memory_space<vmem>>, vector<1x8x1xf32>,
    return
  }
  func.func @transform_0(%arg0: i32) -> (i32, i32, i32) {
    %c0_i32 = arith.constant 0 : i32
    %c0_i32_0 = arith.constant 0 : i32
    %c0_i32_1 = arith.constant 0 : i32
    %c0_i32_2 = arith.constant 0 : i32
    return %c0_i32, %c0_i32_0, %c0_i32_1 : i32, i32, i32
  }
  func.func @transform_1(%arg0: i32) -> (i32, i32) {
    %c0_i32 = arith.constant 0 : i32
    %c0_i32_0 = arith.constant 0 : i32
    %c0_i32_1 = arith.constant 0 : i32
    return %c0_i32, %c0_i32_0 : i32, i32
  }
  func.func @transform_2(%arg0: i32) -> (i32, i32) {
    %c0_i32 = arith.constant 0 : i32
    %c0_i32_0 = arith.constant 0 : i32
    %c0_i32_1 = arith.constant 0 : i32
    return %c0_i32, %c0_i32_0 : i32, i32
  }
  func.func @transform_3(%arg0: i32) -> (i32, i32) {
    %c0_i32 = arith.constant 0 : i32
    %c0_i32_0 = arith.constant 0 : i32
    %c0_i32_1 = arith.constant 0 : i32
    return %c0_i32, %c0_i32_0 : i32, i32
  }
  func.func @transform_4(%arg0: i32) -> (i32, i32) {
    %c0_i32 = arith.constant 0 : i32
    %c0_i32_0 = arith.constant 0 : i32
    %c0_i32_1 = arith.constant 0 : i32
    return %c0_i32, %c0_i32_0 : i32, i32
  }
  func.func @transform_5(%arg0: i32) -> (i32, i32) {
    %c0_i32 = arith.constant 0 : i32
    %c0_i32_0 = arith.constant 0 : i32
    %c0_i32_1 = arith.constant 0 : i32
    return %c0_i32, %c0_i32_0 : i32, i32
  }
  func.func @transform_6(%arg0: i32) -> (i32, i32) {
    %c0_i32 = arith.constant 0 : i32
    %c0_i32_0 = arith.constant 0 : i32
    %c0_i32_1 = arith.constant 0 : i32
    return %c0_i32, %c0_i32_0 : i32, i32
  }
  func.func @transform_7(%arg0: i32) -> (i32, i32) {
    %c0_i32 = arith.constant 0 : i32
    %c0_i32_0 = arith.constant 0 : i32
    %c0_i32_1 = arith.constant 0 : i32
    return %c0_i32, %c0_i32_0 : i32, i32
  }
  func.func @transform_8(%arg0: i32) -> (i32, i32, i32) {
    %c0_i32 = arith.constant 0 : i32
    %c0_i32_0 = arith.constant 0 : i32
    %c0_i32_1 = arith.constant 0 : i32
    %c0_i32_2 = arith.constant 0 : i32
    return %c0_i32, %c0_i32_0, %c0_i32_1 : i32, i32, i32
  }
}

</mosaic_0001>

<bundles_post_ra>
// kernel: tpu_custom_call.1
= control target key start
LH: loop header
LB: loop body
LE: loop exit
PB: predicated region body
PF: predicated region fallthrough
CT: control target
= control target key end

     0   :  { %vm31_vm0 = vcmask 261120   ;;  %v3063_v0 = vmov 0.0|0.0   ;;  %vm3064_vm1 = vmmov 0   ;;  %v3065_v4 = vmov 0.0   ;;  %s3068_s19 = smov 64   ;;  %s3069_s30 = smov 96   ;;  %s3684_s2 = inlined_call_operand.vmem [shape: f32[32,128], index: 2, kind: input, shape index: {}]   ;;  %s3685_s0 = inlined_call_operand.vmem [shape: f32[8,8,1], index: 0, kind: input, shape index: {}]   ;;  %s3686_s1 = inlined_call_operand.vmem [shape: f32[1,128], index: 1, kind: input, shape index: {}]   ;;  %s3687_s3 = inlined_call_operand.vmem [shape: f32[1,128], index: 3, kind: input, shape index: {}]   ;;  %s3688_s4 = inlined_call_operand.vmem [shape: f32[32,128], index: 4, kind: input, shape index: {}]   ;;  %s3689_s5 = inlined_call_operand.vmem [shape: f32[1,128], index: 5, kind: input, shape index: {}]   ;;  %s3690_s6 = inlined_call_operand.vmem [shape: f32[1,32], index: 6, kind: input, shape index: {}]   ;;  %s3691_s7 = inlined_call_operand.<no memory space> [shape: f32[1,1], index: 7, kind: input, shape index: {}]   ;;  %s3692_s8 = inlined_call_operand.vmem [shape: f32[10,8,1], index: 8, kind: output, shape index: {}]  }
   0x1   :  { %2772 = vmatprep.subr.bf16.mxu0 %v3063_v0  ;;  %v43_v1 = vld [vmem:[%s3684_s2] sm:$0xff]  ;;  %v44_v2 = vld [vmem:[%s3684_s2 + $0x8] sm:$0xff]  ;;  %v45_v3 = vld [vmem:[%s3684_s2 + $0x10] sm:$0xff]  ;;  %2560 = vmatprep.mubr.msk.f32.mxu0 %vm3064_vm1, %v3065_v4  ;;  %32 = vst.msk [vmem:[#allocation2] sm:$0xff] %vm31_vm0, %v3065_v4  ;;  %v3066_v7 = vmov 0   ;;  %vm34_vm2 = vcmask 7168  }
   0x2   :  { %33 = vst.msk [vmem:[#allocation3] sm:$0xff] %vm31_vm0, %v3065_v4  ;;  %v3131_v5 = vpack.c.bf16 %v44_v2, %v43_v1  ;;  %v46_v6 = vld [vmem:[%s3684_s2 + $0x18] sm:$0xff]  ;;  %2899 = vset.pattern.permute.xlu0 %v3066_v7  ;;  %v78_v8 = vld [vmem:[%s3685_s0] sm:$0xff]  ;;  %2778 = vmatprep.subr.bf16.mxu1 %v3063_v0  ;;  %s3067_s2 = smov 32   ;;  %v2400_v32 = vld [vmem:[%s3685_s0 + $0x8] sm:$0xff] }
   0x3   :  { %81 = vperm.xlu0 %2899, %v78_v8   ;;  %2571 = vmatprep.mubr.msk.f32.mxu1 %vm3064_vm1, %v3065_v4  ;;  %v3143_v9 = vpack.c.bf16 %v46_v6, %v45_v3  ;;  %v3159_v12 = vld [vmem:[%s3686_s1] ss:$0 sm:$0xff]  ;;  %v55_v34 = vld [vmem:[%s3688_s4 + $0x8] sm:$0xff]  ;;  %v56_v35 = vld [vmem:[%s3688_s4 + $0x10] sm:$0xff]  ;;  %35 = vst.msk [vmem:[#allocation4] sm:$0xff] %vm34_vm2, %v3065_v4 }
   0x4   :  { %2774 = vmatpush3.bf16.msra.mxu0 %v3131_v5  ;;  %2900 = vset.pattern.permute.xlu1 %v3066_v7  ;;  %v3165_v15 = vld [vmem:[%s3687_s3] ss:$0 sm:$0xff]  ;;  %v57_v37 = vld [vmem:[%s3688_s4 + $0x18] sm:$0xff]  ;;  %v2406_v6 = vld [vmem:[%s3685_s0 + $0x10] sm:$0xff] }
   0x5   :  { %2775 = vmatprep.subr.bf16.mxu0 %v3063_v0  ;;  %v54_v33 = vld [vmem:[%s3688_s4] sm:$0xff]  ;;  %v3192_v38 = vpack.c.bf16 %v57_v37, %v56_v35  ;;  %v2412_v35 = vld [vmem:[%s3685_s0 + $0x18] sm:$0xff] }
   0x6   :  { %v3186_v36 = vpack.c.bf16 %v55_v34, %v54_v33 }
   0x8   :  { %2777 = vmatpush3.bf16.msra.mxu0 %v3143_v9  ;;  %v85_v10 = vld [vmem:[#allocation2] sm:$0xff]  ;;  %2780 = vmatpush3.bf16.msra.mxu1 %v3186_v36 }
   0x9   :  { %v168_v11 = vld [vmem:[#allocation3] sm:$0xff]  ;;  %2784 = vmatprep.subr.bf16.mxu0 %v3063_v0  ;;  %2781 = vmatprep.subr.bf16.mxu1 %v3063_v0 }
   0xa   :  { %170 = vrot.lane.b32.xlu1 %v168_v11, %s3067_s2 }
   0xb   :  { %2561 = vmatmul.mubr.msk.f32.vlgmr.msra.gmra.mrb[0].mxu0 %vm31_vm0, %v85_v10 }
   0xc   :  { %2786 = vmatpush3.bf16.msra.mxu0 %v3131_v5  ;;  %2582 = vmatprep.mubr.msk.f32.mxu0 %vm3064_vm1, %v3065_v4 }
   0xd   :  { %2787 = vmatprep.subr.bf16.mxu0 %v3063_v0  ;;  %2783 = vmatpush3.bf16.msra.mxu1 %v3192_v38 }
   0xe   :  { %2790 = vmatprep.subr.bf16.mxu1 %v3063_v0 }
  0x10   :  { %2789 = vmatpush3.bf16.msra.mxu0 %v3143_v9 }
  0x11   :  { %2796 = vmatprep.subr.bf16.mxu0 %v3063_v0 }
  0x7c   :  { %v171_v27 = vpop.permute.xlu1 %170 }
  0x82   :  { %v82_v13 = vpop.permute.xlu0 %81 }
  0x83   :  { %v84_v14 = vmul.f32 %v3159_v12, %v82_v13 }
  0xde   :  { %v155_v16 = vpop.f32.mrb[0].mxu0 }
  0xdf   :  { %v159_v17 = vadd.f32 %v155_v16, %v84_v14  ;;  %v2562_v18 = vpop.f32.mrb[1].mxu0 }
  0xe1   :  { %v160_v19 = vadd.f32 %v3165_v15, %v159_v17 }
  0xe3   :  { %2901 = vtanh.f32 %v160_v19  ;;  %v2397_v21 = vmul.f32 -1.442695, %v160_v19 }
  0xe5   :  { %2903 = vpow2.f32 %v2397_v21 }
  0xed   :  { %v2902_v20 = vpop.eup %2901 }
  0xee   :  { %175 = vrot.lane.b32.xlu0 %v2902_v20, %s3068_s19 }
  0xef   :  { %v2904_v22 = vpop.eup %2903 }
  0xf0   :  { %v164_v23 = vadd.f32 1.0, %v2904_v22 }
  0xf2   :  { %2905 = vrcp.f32 %v164_v23 }
  0xfc   :  { %v2906_v24 = vpop.eup %2905 }
  0xfd   :  { %v173_v28 = vmul.f32 %v2906_v24, %v171_v27 }
 0x160   :  { %v176_v25 = vpop.permute.xlu0 %175 }
 0x161   :  { %v178_v26 = vmul.f32 %v2906_v24, %v176_v25 }
 0x163   :  { %180 = vrot.lane.b32.xlu1 %v178_v26, %s3067_s2 }
 0x1d5   :  { %v181_v29 = vpop.permute.xlu1 %180 }
 0x1d6   :  { %v3170_v30 = vadd.f32 %v181_v29, %v173_v28 }
 0x1d8   :  { %2907 = vtanh.f32 %v3170_v30 }
 0x1e2   :  { %v2908_v31 = vpop.eup %2907 }
 0x1e3   :  { %186 = vrot.lane.b32.xlu0 %v2908_v31, %s3068_s19 }
 0x1e7   :  { %314 = vperm.xlu0 %2899, %v2400_v32  }
 0x255   :  { %v187_v39 = vpop.permute.xlu0 %186 }
 0x256   :  { %v189_v40 = vmul.f32 %v2906_v24, %v187_v39 }
 0x258   :  { %191 = vrot.lane.b32.xlu1 %v189_v40, %s3067_s2 }
 0x25c   :  { %304 = vrot.lane.b32.xlu1 %v3170_v30, %s3069_s30 }
 0x266   :  { %v315_v47 = vpop.permute.xlu0 %314 }
 0x267   :  { %v317_v48 = vmul.f32 %v3159_v12, %v315_v47 }
 0x2ca   :  { %v192_v41 = vpop.permute.xlu1 %191 }
 0x2cb   :  { %302 = vst.msk [vmem:[#allocation2] sm:$0xff] %vm31_vm0, %v192_v41  ;;  %2572 = vmatmul.mubr.msk.f32.vlgmr.msra.gmra.mrb[0].mxu1 %vm31_vm0, %v192_v41 }
 0x2cc   :  { %2792 = vmatpush3.bf16.msra.mxu1 %v3186_v36  ;;  %2593 = vmatprep.mubr.msk.f32.mxu1 %vm3064_vm1, %v3065_v4 }
 0x2cd   :  { %2793 = vmatprep.subr.bf16.mxu1 %v3063_v0 }
 0x2ce   :  { %v305_v42 = vpop.permute.xlu1 %304 }
 0x2cf   :  { %307 = vst.msk [vmem:[#allocation3] sm:$0xff] %vm31_vm0, %v305_v42 }
 0x2d0   :  { %2795 = vmatpush3.bf16.msra.mxu1 %v3192_v38 }
 0x2d1   :  { %2802 = vmatprep.subr.bf16.mxu1 %v3063_v0 }
 0x2d2   :  { %v318_v43 = vld [vmem:[#allocation2] sm:$0xff] }
 0x2d3   :  { %2583 = vmatmul.mubr.msk.f32.vlgmr.msra.gmra.mrb[2].mxu0 %vm31_vm0, %v318_v43 }
 0x2d4   :  { %2798 = vmatpush3.bf16.msra.mxu0 %v3131_v5  ;;  %2604 = vmatprep.mubr.msk.f32.mxu0 %vm3064_vm1, %v3065_v4 }
 0x2d5   :  { %2799 = vmatprep.subr.bf16.mxu0 %v3063_v0 }
 0x2d6   :  { %v401_v44 = vld [vmem:[#allocation3] sm:$0xff] }
 0x2d7   :  { %403 = vrot.lane.b32.xlu1 %v401_v44, %s3067_s2 }
 0x2d8   :  { %2801 = vmatpush3.bf16.msra.mxu0 %v3143_v9 }
 0x2d9   :  { %2808 = vmatprep.subr.bf16.mxu0 %v3063_v0 }
 0x349   :  { %v404_v60 = vpop.permute.xlu1 %403 }
 0x39e   :  { %v3217_v45 = vpop.f32.mrb[0].mxu1 }
 0x39f   :  { %v2573_v46 = vpop.f32.mrb[1].mxu1 }
 0x3a6   :  { %v388_v49 = vpop.f32.mrb[2].mxu0 }
 0x3a7   :  { %v392_v50 = vadd.f32 %v388_v49, %v317_v48  ;;  %v2584_v51 = vpop.f32.mrb[3].mxu0 }
 0x3a9   :  { %v393_v52 = vadd.f32 %v3165_v15, %v392_v50 }
 0x3ab   :  { %2909 = vtanh.f32 %v393_v52  ;;  %v2402_v54 = vmul.f32 -1.442695, %v393_v52 }
 0x3ad   :  { %2911 = vpow2.f32 %v2402_v54 }
 0x3b5   :  { %v2910_v53 = vpop.eup %2909 }
 0x3b6   :  { %408 = vrot.lane.b32.xlu0 %v2910_v53, %s3068_s19 }
 0x3b7   :  { %v2912_v55 = vpop.eup %2911 }
 0x3b8   :  { %v397_v56 = vadd.f32 1.0, %v2912_v55 }
 0x3ba   :  { %2913 = vrcp.f32 %v397_v56 }
 0x3c4   :  { %v2914_v57 = vpop.eup %2913 }
 0x3c5   :  { %v406_v61 = vmul.f32 %v2914_v57, %v404_v60 }
 0x428   :  { %v409_v58 = vpop.permute.xlu0 %408 }
 0x429   :  { %v411_v59 = vmul.f32 %v2914_v57, %v409_v58 }
 0x42b   :  { %413 = vrot.lane.b32.xlu0 %v411_v59, %s3067_s2 }
 0x49d   :  { %v414_v62 = vpop.permute.xlu0 %413 }
 0x49e   :  { %v3223_v63 = vadd.f32 %v414_v62, %v406_v61 }
 0x4a0   :  { %2915 = vtanh.f32 %v3223_v63 }
 0x4aa   :  { %v2916_v1 = vpop.eup %2915 }
 0x4ab   :  { %419 = vrot.lane.b32.xlu1 %v2916_v1, %s3068_s19 }
 0x4af   :  { %545 = vperm.xlu1 %2900, %v2406_v6  }
 0x51d   :  { %v420_v2 = vpop.permute.xlu1 %419 }
 0x51e   :  { %v422_v3 = vmul.f32 %v2914_v57, %v420_v2 }
 0x520   :  { %424 = vrot.lane.b32.xlu0 %v422_v3, %s3067_s2  ;;  %v2418_v3 = vld [vmem:[%s3685_s0 + $0x20] sm:$0xff] }
 0x524   :  { %534 = vrot.lane.b32.xlu0 %v3223_v63, %s3069_s30 }
 0x52e   :  { %v546_v16 = vpop.permute.xlu1 %545 }
 0x52f   :  { %v548_v17 = vmul.f32 %v3159_v12, %v546_v16 }
 0x592   :  { %v425_v7 = vpop.permute.xlu0 %424 }
 0x593   :  { %532 = vst.msk [vmem:[#allocation2] sm:$0xff] %vm31_vm0, %v425_v7  ;;  %2594 = vmatmul.mubr.msk.f32.vlgmr.msra.gmra.mrb[2].mxu1 %vm31_vm0, %v425_v7 }
 0x594   :  { %2804 = vmatpush3.bf16.msra.mxu1 %v3186_v36  ;;  %2615 = vmatprep.mubr.msk.f32.mxu1 %vm3064_vm1, %v3065_v4 }
 0x595   :  { %2805 = vmatprep.subr.bf16.mxu1 %v3063_v0 }
 0x596   :  { %v535_v8 = vpop.permute.xlu0 %534 }
 0x597   :  { %537 = vst.msk [vmem:[#allocation3] sm:$0xff] %vm31_vm0, %v535_v8 }
 0x598   :  { %2807 = vmatpush3.bf16.msra.mxu1 %v3192_v38 }
 0x599   :  { %2814 = vmatprep.subr.bf16.mxu1 %v3063_v0 }
 0x59a   :  { %v549_v10 = vld [vmem:[#allocation2] sm:$0xff] }
 0x59b   :  { %2605 = vmatmul.mubr.msk.f32.vlgmr.msra.gmra.mrb[4].mxu0 %vm31_vm0, %v549_v10 }
 0x59c   :  { %2810 = vmatpush3.bf16.msra.mxu0 %v3131_v5  ;;  %2626 = vmatprep.mubr.msk.f32.mxu0 %vm3064_vm1, %v3065_v4 }
 0x59d   :  { %2811 = vmatprep.subr.bf16.mxu0 %v3063_v0 }
 0x59e   :  { %v632_v11 = vld [vmem:[#allocation3] sm:$0xff] }
 0x59f   :  { %634 = vrot.lane.b32.xlu0 %v632_v11, %s3067_s2 }
 0x5a0   :  { %2813 = vmatpush3.bf16.msra.mxu0 %v3143_v9 }
 0x5a1   :  { %2820 = vmatprep.subr.bf16.mxu0 %v3063_v0 }
 0x611   :  { %v635_v29 = vpop.permute.xlu0 %634 }
 0x666   :  { %v3250_v13 = vpop.f32.mrb[2].mxu1 }
 0x667   :  { %v2595_v14 = vpop.f32.mrb[3].mxu1 }
 0x66e   :  { %v619_v18 = vpop.f32.mrb[4].mxu0 }
 0x66f   :  { %v623_v19 = vadd.f32 %v619_v18, %v548_v17  ;;  %v2606_v20 = vpop.f32.mrb[5].mxu0 }
 0x671   :  { %v624_v21 = vadd.f32 %v3165_v15, %v623_v19 }
 0x673   :  { %2917 = vtanh.f32 %v624_v21  ;;  %v2408_v23 = vmul.f32 -1.442695, %v624_v21 }
 0x675   :  { %2919 = vpow2.f32 %v2408_v23 }
 0x67d   :  { %v2918_v22 = vpop.eup %2917 }
 0x67e   :  { %639 = vrot.lane.b32.xlu1 %v2918_v22, %s3068_s19 }
 0x67f   :  { %v2920_v24 = vpop.eup %2919 }
 0x680   :  { %v628_v25 = vadd.f32 1.0, %v2920_v24 }
 0x682   :  { %2921 = vrcp.f32 %v628_v25 }
 0x68c   :  { %v2922_v26 = vpop.eup %2921 }
 0x68d   :  { %v637_v31 = vmul.f32 %v2922_v26, %v635_v29 }
 0x6f0   :  { %v640_v27 = vpop.permute.xlu1 %639 }
 0x6f1   :  { %v642_v28 = vmul.f32 %v2922_v26, %v640_v27 }
 0x6f3   :  { %644 = vrot.lane.b32.xlu1 %v642_v28, %s3067_s2 }
 0x765   :  { %v645_v32 = vpop.permute.xlu1 %644 }
 0x766   :  { %v3256_v33 = vadd.f32 %v645_v32, %v637_v31 }
 0x768   :  { %2923 = vtanh.f32 %v3256_v33 }
 0x772   :  { %v2924_v34 = vpop.eup %2923 }
 0x773   :  { %650 = vrot.lane.b32.xlu0 %v2924_v34, %s3068_s19 }
 0x777   :  { %776 = vperm.xlu0 %2899, %v2412_v35  }
 0x7e5   :  { %v651_v37 = vpop.permute.xlu0 %650 }
 0x7e6   :  { %v653_v39 = vmul.f32 %v2922_v26, %v651_v37 }
 0x7e8   :  { %655 = vrot.lane.b32.xlu1 %v653_v39, %s3067_s2 }
 0x7ec   :  { %765 = vrot.lane.b32.xlu1 %v3256_v33, %s3069_s30 }
 0x7f6   :  { %v777_v47 = vpop.permute.xlu0 %776 }
 0x7f7   :  { %v779_v48 = vmul.f32 %v3159_v12, %v777_v47 }
 0x85a   :  { %v656_v40 = vpop.permute.xlu1 %655 }
 0x85b   :  { %763 = vst.msk [vmem:[#allocation2] sm:$0xff] %vm31_vm0, %v656_v40  ;;  %2616 = vmatmul.mubr.msk.f32.vlgmr.msra.gmra.mrb[4].mxu1 %vm31_vm0, %v656_v40  ;;  %v2424_v40 = vld [vmem:[%s3685_s0 + $0x28] sm:$0xff] }
 0x85c   :  { %2816 = vmatpush3.bf16.msra.mxu1 %v3186_v36  ;;  %2637 = vmatprep.mubr.msk.f32.mxu1 %vm3064_vm1, %v3065_v4 }
 0x85d   :  { %2817 = vmatprep.subr.bf16.mxu1 %v3063_v0 }
 0x85e   :  { %v766_v41 = vpop.permute.xlu1 %765 }
 0x85f   :  { %768 = vst.msk [vmem:[#allocation3] sm:$0xff] %vm31_vm0, %v766_v41 }
 0x860   :  { %2819 = vmatpush3.bf16.msra.mxu1 %v3192_v38 }
 0x861   :  { %2826 = vmatprep.subr.bf16.mxu1 %v3063_v0 }
 0x862   :  { %v780_v42 = vld [vmem:[#allocation2] sm:$0xff] }
 0x863   :  { %2627 = vmatmul.mubr.msk.f32.vlgmr.msra.gmra.mrb[6].mxu0 %vm31_vm0, %v780_v42 }
 0x864   :  { %2822 = vmatpush3.bf16.msra.mxu0 %v3131_v5  ;;  %2648 = vmatprep.mubr.msk.f32.mxu0 %vm3064_vm1, %v3065_v4 }
 0x865   :  { %2823 = vmatprep.subr.bf16.mxu0 %v3063_v0 }
 0x866   :  { %v863_v43 = vld [vmem:[#allocation3] sm:$0xff] }
 0x867   :  { %865 = vrot.lane.b32.xlu1 %v863_v43, %s3067_s2 }
 0x868   :  { %2825 = vmatpush3.bf16.msra.mxu0 %v3143_v9 }
 0x869   :  { %2832 = vmatprep.subr.bf16.mxu0 %v3063_v0 }
 0x8d9   :  { %v866_v60 = vpop.permute.xlu1 %865 }
 0x92e   :  { %v3283_v44 = vpop.f32.mrb[4].mxu1 }
 0x92f   :  { %v2617_v46 = vpop.f32.mrb[5].mxu1 }
 0x936   :  { %v850_v49 = vpop.f32.mrb[6].mxu0 }
 0x937   :  { %v854_v50 = vadd.f32 %v850_v49, %v779_v48  ;;  %v2628_v51 = vpop.f32.mrb[7].mxu0 }
 0x939   :  { %v855_v52 = vadd.f32 %v3165_v15, %v854_v50 }
 0x93b   :  { %2925 = vtanh.f32 %v855_v52  ;;  %v2414_v54 = vmul.f32 -1.442695, %v855_v52 }
 0x93d   :  { %2927 = vpow2.f32 %v2414_v54 }
 0x945   :  { %v2926_v53 = vpop.eup %2925 }
 0x946   :  { %870 = vrot.lane.b32.xlu0 %v2926_v53, %s3068_s19 }
 0x947   :  { %v2928_v55 = vpop.eup %2927 }
 0x948   :  { %v859_v56 = vadd.f32 1.0, %v2928_v55 }
 0x94a   :  { %2929 = vrcp.f32 %v859_v56 }
 0x954   :  { %v2930_v57 = vpop.eup %2929 }
 0x955   :  { %v868_v61 = vmul.f32 %v2930_v57, %v866_v60 }
 0x9b8   :  { %v871_v58 = vpop.permute.xlu0 %870 }
 0x9b9   :  { %v873_v59 = vmul.f32 %v2930_v57, %v871_v58 }
 0x9bb   :  { %875 = vrot.lane.b32.xlu0 %v873_v59, %s3067_s2 }
 0xa2d   :  { %v876_v62 = vpop.permute.xlu0 %875 }
 0xa2e   :  { %v3289_v1 = vadd.f32 %v876_v62, %v868_v61 }
 0xa30   :  { %2931 = vtanh.f32 %v3289_v1 }
 0xa3a   :  { %v2932_v2 = vpop.eup %2931 }
 0xa3b   :  { %881 = vrot.lane.b32.xlu1 %v2932_v2, %s3068_s19 }
 0xa3f   :  { %1007 = vperm.xlu1 %2900, %v2418_v3  }
 0xaad   :  { %v882_v6 = vpop.permute.xlu1 %881 }
 0xaae   :  { %v884_v7 = vmul.f32 %v2930_v57, %v882_v6 }
 0xab0   :  { %886 = vrot.lane.b32.xlu0 %v884_v7, %s3067_s2 }
 0xab4   :  { %996 = vrot.lane.b32.xlu0 %v3289_v1, %s3069_s30 }
 0xabe   :  { %v1008_v18 = vpop.permute.xlu1 %1007 }
 0xabf   :  { %v1010_v19 = vmul.f32 %v3159_v12, %v1008_v18 }
 0xb22   :  { %v887_v8 = vpop.permute.xlu0 %886 }
 0xb23   :  { %994 = vst.msk [vmem:[#allocation2] sm:$0xff] %vm31_vm0, %v887_v8  ;;  %2638 = vmatmul.mubr.msk.f32.vlgmr.msra.gmra.mrb[6].mxu1 %vm31_vm0, %v887_v8 }
 0xb24   :  { %2828 = vmatpush3.bf16.msra.mxu1 %v3186_v36  ;;  %2659 = vmatprep.mubr.msk.f32.mxu1 %vm3064_vm1, %v3065_v4 }
 0xb25   :  { %2829 = vmatprep.subr.bf16.mxu1 %v3063_v0 }
 0xb26   :  { %v997_v10 = vpop.permute.xlu0 %996 }
 0xb27   :  { %999 = vst.msk [vmem:[#allocation3] sm:$0xff] %vm31_vm0, %v997_v10 }
 0xb28   :  { %2831 = vmatpush3.bf16.msra.mxu1 %v3192_v38 }
 0xb29   :  { %2838 = vmatprep.subr.bf16.mxu1 %v3063_v0 }
 0xb2a   :  { %v1011_v11 = vld [vmem:[#allocation2] sm:$0xff] }
 0xb2b   :  { %2649 = vmatmul.mubr.msk.f32.vlgmr.msra.gmra.mrb[8].mxu0 %vm31_vm0, %v1011_v11  ;;  %v2430_v11 = vld [vmem:[%s3685_s0 + $0x30] sm:$0xff] }
 0xb2c   :  { %2834 = vmatpush3.bf16.msra.mxu0 %v3131_v5  ;;  %2670 = vmatprep.mubr.msk.f32.mxu0 %vm3064_vm1, %v3065_v4 }
 0xb2d   :  { %2835 = vmatprep.subr.bf16.mxu0 %v3063_v0 }
 0xb2e   :  { %v1094_v14 = vld [vmem:[#allocation3] sm:$0xff] }
 0xb2f   :  { %1096 = vrot.lane.b32.xlu0 %v1094_v14, %s3067_s2 }
 0xb30   :  { %2837 = vmatpush3.bf16.msra.mxu0 %v3143_v9 }
 0xb31   :  { %2844 = vmatprep.subr.bf16.mxu0 %v3063_v0 }
 0xba1   :  { %v1097_v32 = vpop.permute.xlu0 %1096 }
 0xbf6   :  { %v3316_v16 = vpop.f32.mrb[6].mxu1 }
 0xbf7   :  { %v2639_v17 = vpop.f32.mrb[7].mxu1 }
 0xbfe   :  { %v1081_v20 = vpop.f32.mrb[8].mxu0 }
 0xbff   :  { %v1085_v21 = vadd.f32 %v1081_v20, %v1010_v19  ;;  %v2650_v22 = vpop.f32.mrb[9].mxu0 }
 0xc01   :  { %v1086_v23 = vadd.f32 %v3165_v15, %v1085_v21 }
 0xc03   :  { %2933 = vtanh.f32 %v1086_v23  ;;  %v2420_v25 = vmul.f32 -1.442695, %v1086_v23 }
 0xc05   :  { %2935 = vpow2.f32 %v2420_v25 }
 0xc0d   :  { %v2934_v24 = vpop.eup %2933 }
 0xc0e   :  { %1101 = vrot.lane.b32.xlu1 %v2934_v24, %s3068_s19 }
 0xc0f   :  { %v2936_v26 = vpop.eup %2935 }
 0xc10   :  { %v1090_v27 = vadd.f32 1.0, %v2936_v26 }
 0xc12   :  { %2937 = vrcp.f32 %v1090_v27 }
 0xc1c   :  { %v2938_v28 = vpop.eup %2937 }
 0xc1d   :  { %v1099_v34 = vmul.f32 %v2938_v28, %v1097_v32 }
 0xc80   :  { %v1102_v29 = vpop.permute.xlu1 %1101 }
 0xc81   :  { %v1104_v31 = vmul.f32 %v2938_v28, %v1102_v29 }
 0xc83   :  { %1106 = vrot.lane.b32.xlu1 %v1104_v31, %s3067_s2 }
 0xcf5   :  { %v1107_v35 = vpop.permute.xlu1 %1106 }
 0xcf6   :  { %v3322_v37 = vadd.f32 %v1107_v35, %v1099_v34 }
 0xcf8   :  { %2939 = vtanh.f32 %v3322_v37 }
 0xd02   :  { %v2940_v39 = vpop.eup %2939 }
 0xd03   :  { %1112 = vrot.lane.b32.xlu0 %v2940_v39, %s3068_s19 }
 0xd07   :  { %1238 = vperm.xlu0 %2899, %v2424_v40  }
 0xd75   :  { %v1113_v41 = vpop.permute.xlu0 %1112 }
 0xd76   :  { %v1115_v42 = vmul.f32 %v2938_v28, %v1113_v41 }
 0xd78   :  { %1117 = vrot.lane.b32.xlu1 %v1115_v42, %s3067_s2 }
 0xd7c   :  { %1227 = vrot.lane.b32.xlu1 %v3322_v37, %s3069_s30 }
 0xd86   :  { %v1239_v51 = vpop.permute.xlu0 %1238 }
 0xd87   :  { %v1241_v52 = vmul.f32 %v3159_v12, %v1239_v51 }
 0xdea   :  { %v1118_v43 = vpop.permute.xlu1 %1117 }
 0xdeb   :  { %1225 = vst.msk [vmem:[#allocation2] sm:$0xff] %vm31_vm0, %v1118_v43  ;;  %2660 = vmatmul.mubr.msk.f32.vlgmr.msra.gmra.mrb[8].mxu1 %vm31_vm0, %v1118_v43 }
 0xdec   :  { %2840 = vmatpush3.bf16.msra.mxu1 %v3186_v36  ;;  %2681 = vmatprep.mubr.msk.f32.mxu1 %vm3064_vm1, %v3065_v4 }
 0xded   :  { %2841 = vmatprep.subr.bf16.mxu1 %v3063_v0 }
 0xdee   :  { %v1228_v46 = vpop.permute.xlu1 %1227 }
 0xdef   :  { %1230 = vst.msk [vmem:[#allocation3] sm:$0xff] %vm31_vm0, %v1228_v46 }
 0xdf0   :  { %2843 = vmatpush3.bf16.msra.mxu1 %v3192_v38 }
 0xdf1   :  { %2850 = vmatprep.subr.bf16.mxu1 %v3063_v0 }
 0xdf2   :  { %v1242_v47 = vld [vmem:[#allocation2] sm:$0xff] }
 0xdf3   :  { %2671 = vmatmul.mubr.msk.f32.vlgmr.msra.gmra.mrb[10].mxu0 %vm31_vm0, %v1242_v47 }
 0xdf4   :  { %2846 = vmatpush3.bf16.msra.mxu0 %v3131_v5  ;;  %2692 = vmatprep.mubr.msk.f32.mxu0 %vm3064_vm1, %v3065_v4 }
 0xdf5   :  { %2847 = vmatprep.subr.bf16.mxu0 %v3063_v0 }
 0xdf6   :  { %v1325_v48 = vld [vmem:[#allocation3] sm:$0xff] }
 0xdf7   :  { %1327 = vrot.lane.b32.xlu1 %v1325_v48, %s3067_s2 }
 0xdf8   :  { %2849 = vmatpush3.bf16.msra.mxu0 %v3143_v9 }
 0xdf9   :  { %2856 = vmatprep.subr.bf16.mxu0 %v3063_v0 }
 0xe69   :  { %v1328_v3 = vpop.permute.xlu1 %1327 }
 0xebe   :  { %v3349_v49 = vpop.f32.mrb[8].mxu1 }
 0xebf   :  { %v2661_v50 = vpop.f32.mrb[9].mxu1 }
 0xec0   :  { %v2436_v50 = vld [vmem:[%s3685_s0 + $0x38] sm:$0xff] }
 0xec6   :  { %v1312_v53 = vpop.f32.mrb[10].mxu0 }
 0xec7   :  { %v1316_v54 = vadd.f32 %v1312_v53, %v1241_v52  ;;  %v2672_v55 = vpop.f32.mrb[11].mxu0 }
 0xec9   :  { %v1317_v56 = vadd.f32 %v3165_v15, %v1316_v54 }
 0xecb   :  { %2941 = vtanh.f32 %v1317_v56  ;;  %v2426_v58 = vmul.f32 -1.442695, %v1317_v56 }
 0xecd   :  { %2943 = vpow2.f32 %v2426_v58 }
 0xed5   :  { %v2942_v57 = vpop.eup %2941 }
 0xed6   :  { %1332 = vrot.lane.b32.xlu0 %v2942_v57, %s3068_s19 }
 0xed7   :  { %v2944_v59 = vpop.eup %2943 }
 0xed8   :  { %v1321_v60 = vadd.f32 1.0, %v2944_v59 }
 0xeda   :  { %2945 = vrcp.f32 %v1321_v60 }
 0xee4   :  { %v2946_v61 = vpop.eup %2945 }
 0xee5   :  { %v1330_v6 = vmul.f32 %v2946_v61, %v1328_v3 }
 0xf48   :  { %v1333_v62 = vpop.permute.xlu0 %1332 }
 0xf49   :  { %v1335_v2 = vmul.f32 %v2946_v61, %v1333_v62 }
 0xf4b   :  { %1337 = vrot.lane.b32.xlu0 %v1335_v2, %s3067_s2 }
 0xfbd   :  { %v1338_v7 = vpop.permute.xlu0 %1337 }
 0xfbe   :  { %v3355_v8 = vadd.f32 %v1338_v7, %v1330_v6 }
 0xfc0   :  { %2947 = vtanh.f32 %v3355_v8 }
 0xfca   :  { %v2948_v10 = vpop.eup %2947 }
 0xfcb   :  { %1343 = vrot.lane.b32.xlu1 %v2948_v10, %s3068_s19 }
 0xfcf   :  { %1469 = vperm.xlu1 %2900, %v2430_v11  }
0x103d   :  { %v1344_v14 = vpop.permute.xlu1 %1343 }
0x103e   :  { %v1346_v17 = vmul.f32 %v2946_v61, %v1344_v14 }
0x1040   :  { %1348 = vrot.lane.b32.xlu0 %v1346_v17, %s3067_s2 }
0x1044   :  { %1458 = vrot.lane.b32.xlu0 %v3355_v8, %s3069_s30 }
0x104e   :  { %v1470_v24 = vpop.permute.xlu1 %1469 }
0x104f   :  { %v1472_v25 = vmul.f32 %v3159_v12, %v1470_v24 }
0x10b2   :  { %v1349_v18 = vpop.permute.xlu0 %1348 }
0x10b3   :  { %1456 = vst.msk [vmem:[#allocation2] sm:$0xff] %vm31_vm0, %v1349_v18  ;;  %2682 = vmatmul.mubr.msk.f32.vlgmr.msra.gmra.mrb[10].mxu1 %vm31_vm0, %v1349_v18 }
0x10b4   :  { %2852 = vmatpush3.bf16.msra.mxu1 %v3186_v36  ;;  %2703 = vmatprep.mubr.msk.f32.mxu1 %vm3064_vm1, %v3065_v4 }
0x10b5   :  { %2853 = vmatprep.subr.bf16.mxu1 %v3063_v0 }
0x10b6   :  { %v1459_v19 = vpop.permute.xlu0 %1458 }
0x10b7   :  { %1461 = vst.msk [vmem:[#allocation3] sm:$0xff] %vm31_vm0, %v1459_v19 }
0x10b8   :  { %2855 = vmatpush3.bf16.msra.mxu1 %v3192_v38 }
0x10b9   :  { %2862 = vmatprep.subr.bf16.mxu1 %v3063_v0 }
0x10ba   :  { %v1473_v20 = vld [vmem:[#allocation2] sm:$0xff] }
0x10bb   :  { %2693 = vmatmul.mubr.msk.f32.vlgmr.msra.gmra.mrb[12].mxu0 %vm31_vm0, %v1473_v20 }
0x10bc   :  { %2858 = vmatpush3.bf16.msra.mxu0 %v3131_v5  ;;  %2714 = vmatprep.mubr.msk.f32.mxu0 %vm3064_vm1, %v3065_v4 }
0x10bd   :  { %2859 = vmatprep.subr.bf16.mxu0 %v3063_v0 }
0x10be   :  { %v1556_v21 = vld [vmem:[#allocation3] sm:$0xff] }
0x10bf   :  { %1558 = vrot.lane.b32.xlu0 %v1556_v21, %s3067_s2 }
0x10c0   :  { %2861 = vmatpush3.bf16.msra.mxu0 %v3143_v9 }
0x10c1   :  { %2868 = vmatprep.subr.bf16.mxu0 %v3063_v0 }
0x1131   :  { %v1559_v42 = vpop.permute.xlu0 %1558 }
0x1186   :  { %v3382_v22 = vpop.f32.mrb[10].mxu1 }
0x1187   :  { %v2683_v23 = vpop.f32.mrb[11].mxu1 }
0x118e   :  { %v1543_v26 = vpop.f32.mrb[12].mxu0 }
0x118f   :  { %v1547_v27 = vadd.f32 %v1543_v26, %v1472_v25  ;;  %v2694_v28 = vpop.f32.mrb[13].mxu0 }
0x1191   :  { %v1548_v29 = vadd.f32 %v3165_v15, %v1547_v27 }
0x1193   :  { %2949 = vtanh.f32 %v1548_v29  ;;  %v2432_v32 = vmul.f32 -1.442695, %v1548_v29 }
0x1195   :  { %2951 = vpow2.f32 %v2432_v32 }
0x119d   :  { %v2950_v31 = vpop.eup %2949 }
0x119e   :  { %1563 = vrot.lane.b32.xlu1 %v2950_v31, %s3068_s19 }
0x119f   :  { %v2952_v34 = vpop.eup %2951 }
0x11a0   :  { %v1552_v35 = vadd.f32 1.0, %v2952_v34 }
0x11a2   :  { %2953 = vrcp.f32 %v1552_v35 }
0x11ac   :  { %v2954_v39 = vpop.eup %2953 }
0x11ad   :  { %v1561_v43 = vmul.f32 %v2954_v39, %v1559_v42 }
0x1210   :  { %v1564_v40 = vpop.permute.xlu1 %1563 }
0x1211   :  { %v1566_v41 = vmul.f32 %v2954_v39, %v1564_v40 }
0x1213   :  { %1568 = vrot.lane.b32.xlu1 %v1566_v41, %s3067_s2 }
0x1285   :  { %v1569_v46 = vpop.permute.xlu1 %1568 }
0x1286   :  { %v3388_v47 = vadd.f32 %v1569_v46, %v1561_v43 }
0x1288   :  { %2955 = vtanh.f32 %v3388_v47 }
0x1292   :  { %v2956_v48 = vpop.eup %2955 }
0x1293   :  { %1574 = vrot.lane.b32.xlu0 %v2956_v48, %s3068_s19 }
0x1297   :  { %1700 = vperm.xlu0 %2899, %v2436_v50  }
0x1305   :  { %v1575_v51 = vpop.permute.xlu0 %1574 }
0x1306   :  { %v1577_v52 = vmul.f32 %v2954_v39, %v1575_v51 }
0x1308   :  { %1579 = vrot.lane.b32.xlu1 %v1577_v52, %s3067_s2 }
0x130c   :  { %1689 = vrot.lane.b32.xlu1 %v3388_v47, %s3069_s30 }
0x1316   :  { %v1701_v59 = vpop.permute.xlu0 %1700 }
0x1317   :  { %v1703_v60 = vmul.f32 %v3159_v12, %v1701_v59 }
0x137a   :  { %v1580_v53 = vpop.permute.xlu1 %1579 }
0x137b   :  { %1687 = vst.msk [vmem:[#allocation2] sm:$0xff] %vm31_vm0, %v1580_v53  ;;  %2704 = vmatmul.mubr.msk.f32.vlgmr.msra.gmra.mrb[12].mxu1 %vm31_vm0, %v1580_v53 }
0x137c   :  { %2864 = vmatpush3.bf16.msra.mxu1 %v3186_v36  ;;  %2725 = vmatprep.mubr.msk.f32.mxu1 %vm3064_vm1, %v3065_v4 }
0x137d   :  { %2865 = vmatprep.subr.bf16.mxu1 %v3063_v0 }
0x137e   :  { %v1690_v54 = vpop.permute.xlu1 %1689 }
0x137f   :  { %1692 = vst.msk [vmem:[#allocation3] sm:$0xff] %vm31_vm0, %v1690_v54 }
0x1380   :  { %2867 = vmatpush3.bf16.msra.mxu1 %v3192_v38 }
0x1381   :  { %2874 = vmatprep.subr.bf16.mxu1 %v3063_v0 }
0x1382   :  { %v1704_v55 = vld [vmem:[#allocation2] sm:$0xff] }
0x1383   :  { %2715 = vmatmul.mubr.msk.f32.vlgmr.msra.gmra.mrb[14].mxu0 %vm31_vm0, %v1704_v55 }
0x1384   :  { %2870 = vmatpush3.bf16.msra.mxu0 %v3131_v5  ;;  %2736 = vmatprep.mubr.msk.f32.mxu0 %vm3064_vm1, %v3065_v4 }
0x1385   :  { %2871 = vmatprep.subr.bf16.mxu0 %v3063_v0 }
0x1386   :  { %v1787_v56 = vld [vmem:[#allocation3] sm:$0xff] }
0x1387   :  { %1789 = vrot.lane.b32.xlu1 %v1787_v56, %s3067_s2 }
0x1388   :  { %2873 = vmatpush3.bf16.msra.mxu0 %v3143_v9 }
0x1389   :  { %2880 = vmatprep.subr.bf16.mxu0 %v3063_v0 }
0x13f9   :  { %v1790_v12 = vpop.permute.xlu1 %1789 }
0x144e   :  { %v1649_v57 = vpop.f32.mrb[12].mxu1 }
0x144f   :  { %v2705_v58 = vpop.f32.mrb[13].mxu1 }
0x1456   :  { %v1774_v61 = vpop.f32.mrb[14].mxu0 }
0x1457   :  { %v1778_v62 = vadd.f32 %v1774_v61, %v1703_v60  ;;  %v2716_v2 = vpop.f32.mrb[15].mxu0 }
0x1459   :  { %v1779_v3 = vadd.f32 %v3165_v15, %v1778_v62  ;;  %v3422_v15 = vld [vmem:[%s3689_s5] ss:$0 sm:$0xff] }
0x145a   :  { %v262_v23 = vadd.f32 %v3422_v15, %v3217_v45  ;;  %v726_v24 = vadd.f32 %v3422_v15, %v3283_v44  ;;  %v1188_v25 = vadd.f32 %v3422_v15, %v3349_v49  ;;  %v1650_v27 = vadd.f32 %v3422_v15, %v1649_v57 }
0x145b   :  { %2957 = vtanh.f32 %v1779_v3  ;;  %v2438_v7 = vmul.f32 -1.442695, %v1779_v3  ;;  %v495_v41 = vadd.f32 %v3422_v15, %v3250_v13  ;;  %v957_v46 = vadd.f32 %v3422_v15, %v3316_v16 }
0x145c   :  { %v2399_v49 = vmul.f32 -1.442695, %v262_v23  ;;  %v2410_v31 = vmul.f32 -1.442695, %v726_v24  ;;  %v2422_v32 = vmul.f32 -1.442695, %v1188_v25  ;;  %v1419_v51 = vadd.f32 %v3422_v15, %v3382_v22 }
0x145d   :  { %2959 = vpow2.f32 %v2438_v7  ;;  %v2434_v34 = vmul.f32 -1.442695, %v1650_v27 }
0x1465   :  { %v2958_v6 = vpop.eup %2957 }
0x1466   :  { %1794 = vrot.lane.b32.xlu0 %v2958_v6, %s3068_s19 }
0x1467   :  { %v2960_v10 = vpop.eup %2959 }
0x1468   :  { %v1783_v11 = vadd.f32 1.0, %v2960_v10 }
0x146a   :  { %2961 = vrcp.f32 %v1783_v11 }
0x1474   :  { %v2962_v14 = vpop.eup %2961 }
0x1475   :  { %v1792_v19 = vmul.f32 %v2962_v14, %v1790_v12  ;;  %v2394_v12 = vld [vmem:[%s3690_s6] ss:$0 sm:$0xff] }
0x14d8   :  { %v1795_v17 = vpop.permute.xlu0 %1794 }
0x14d9   :  { %v1797_v18 = vmul.f32 %v2962_v14, %v1795_v17 }
0x14db   :  { %1799 = vrot.lane.b32.xlu0 %v1797_v18, %s3067_s2 }
0x154d   :  { %v1800_v20 = vpop.permute.xlu0 %1799 }
0x154e   :  { %v3424_v21 = vadd.f32 %v1800_v20, %v1792_v19  ;;  %v2404_v19 = vmul.f32 -1.442695, %v495_v41  ;;  %v2416_v20 = vmul.f32 -1.442695, %v957_v46 }
0x1550   :  { %2963 = vtanh.f32 %v3424_v21 }
0x1551   :  { %2965 = vtanh.f32 %v262_v23 }
0x1552   :  { %2967 = vtanh.f32 %v726_v24 }
0x1553   :  { %2969 = vtanh.f32 %v1188_v25 }
0x1554   :  { %2971 = vtanh.f32 %v1650_v27 }
0x1555   :  { %2973 = vpow2.f32 %v2399_v49 }
0x1556   :  { %2975 = vpow2.f32 %v2410_v31 }
0x1557   :  { %2977 = vpow2.f32 %v2422_v32 }
0x1558   :  { %2979 = vpow2.f32 %v2434_v34 }
0x155a   :  { %v2964_v26 = vpop.eup %2963 }
0x155b   :  { %1805 = vrot.lane.b32.xlu1 %v2964_v26, %s3068_s19  ;;  %v2966_v28 = vpop.eup %2965 }
0x155c   :  { %v2968_v45 = vpop.eup %2967 }
0x155d   :  { %v2970_v29 = vpop.eup %2969 }
0x155e   :  { %v2972_v44 = vpop.eup %2971 }
0x155f   :  { %274 = vrot.lane.b32.xlu1 %v2966_v28, %s3068_s19  ;;  %v2974_v35 = vpop.eup %2973 }
0x1560   :  { %v268_v39 = vadd.f32 1.0, %v2974_v35  ;;  %v2976_v40 = vpop.eup %2975 }
0x1561   :  { %v732_v42 = vadd.f32 1.0, %v2976_v40  ;;  %v2978_v43 = vpop.eup %2977 }
0x1562   :  { %2981 = vrcp.f32 %v268_v39  ;;  %v1194_v48 = vadd.f32 1.0, %v2978_v43  ;;  %v2980_v50 = vpop.eup %2979 }
0x1563   :  { %738 = vrot.lane.b32.xlu1 %v2968_v45, %s3068_s19  ;;  %2983 = vtanh.f32 %v495_v41  ;;  %v1656_v54 = vadd.f32 1.0, %v2980_v50 }
0x1564   :  { %2985 = vrcp.f32 %v732_v42 }
0x1565   :  { %2987 = vtanh.f32 %v957_v46 }
0x1566   :  { %2989 = vrcp.f32 %v1194_v48 }
0x1567   :  { %1200 = vrot.lane.b32.xlu1 %v2970_v29, %s3068_s19  ;;  %2991 = vtanh.f32 %v1419_v51 }
0x1568   :  { %2993 = vrcp.f32 %v1656_v54 }
0x156b   :  { %1662 = vrot.lane.b32.xlu1 %v2972_v44, %s3068_s19 }
0x156c   :  { %v3446_v13 = vpop.eup %2981 }
0x156d   :  { %v2984_v16 = vpop.eup %2983  ;;  %v272_v11 = vmul.f32 %v3446_v13, %v3170_v30 }
0x156e   :  { %v3451_v57 = vpop.eup %2985 }
0x156f   :  { %v2988_v59 = vpop.eup %2987 }
0x1570   :  { %v3456_v60 = vpop.eup %2989 }
0x1571   :  { %v2992_v2 = vpop.eup %2991 }
0x1572   :  { %v3461_v3 = vpop.eup %2993 }
0x15cd   :  { %v1806_v52 = vpop.permute.xlu1 %1805 }
0x15ce   :  { %v1808_v53 = vmul.f32 %v2962_v14, %v1806_v52 }
0x15d0   :  { %1810 = vrot.lane.b32.xlu0 %v1808_v53, %s3067_s2 }
0x15d1   :  { %v275_v55 = vpop.permute.xlu1 %274 }
0x15d2   :  { %v277_v56 = vmul.f32 %v3446_v13, %v275_v55 }
0x15d4   :  { %507 = vrot.lane.b32.xlu0 %v2984_v16, %s3068_s19  ;;  %279 = vrot.lane.b32.xlu1 %v277_v56, %s3067_s2  ;;  %v736_v16 = vmul.f32 %v3451_v57, %v3256_v33 }
0x15d5   :  { %v739_v22 = vpop.permute.xlu1 %738 }
0x15d6   :  { %v741_v58 = vmul.f32 %v3451_v57, %v739_v22 }
0x15d8   :  { %969 = vrot.lane.b32.xlu0 %v2988_v59, %s3068_s19  ;;  %743 = vrot.lane.b32.xlu1 %v741_v58, %s3067_s2 }
0x15d9   :  { %v1201_v61 = vpop.permute.xlu1 %1200 }
0x15da   :  { %v1203_v62 = vmul.f32 %v3456_v60, %v1201_v61 }
0x15dc   :  { %1431 = vrot.lane.b32.xlu0 %v2992_v2, %s3068_s19  ;;  %1205 = vrot.lane.b32.xlu1 %v1203_v62, %s3067_s2  ;;  %v1198_v2 = vmul.f32 %v3456_v60, %v3322_v37 }
0x15dd   :  { %v1663_v6 = vpop.permute.xlu1 %1662 }
0x15de   :  { %v1665_v7 = vmul.f32 %v3461_v3, %v1663_v6 }
0x15e0   :  { %1667 = vrot.lane.b32.xlu1 %v1665_v7, %s3067_s2 }
0x1642   :  { %v1811_v10 = vpop.permute.xlu0 %1810 }
0x1643   :  { %1918 = vst.msk [vmem:[#allocation2] sm:$0xff] %vm31_vm0, %v1811_v10  ;;  %2726 = vmatmul.mubr.msk.f32.vlgmr.msra.gmra.mrb[14].mxu1 %vm31_vm0, %v1811_v10 }
0x1644   :  { %2876 = vmatpush3.bf16.msra.mxu1 %v3186_v36  ;;  %2747 = vmatprep.mubr.msk.f32.mxu1 %vm3064_vm1, %v3065_v4 }
0x1645   :  { %2877 = vmatprep.subr.bf16.mxu1 %v3063_v0 }
0x1646   :  { %v280_v14 = vpop.permute.xlu1 %279  ;;  %v508_v49 = vpop.permute.xlu0 %507 }
0x1647   :  { %v282_v17 = vadd.f32 %v280_v14, %v272_v11  ;;  %v1660_v14 = vmul.f32 %v3461_v3, %v3388_v47 }
0x1648   :  { %2879 = vmatpush3.bf16.msra.mxu1 %v3192_v38 }
0x1649   :  { %2995 = vtanh.f32 %v282_v17  ;;  %2886 = vmatprep.subr.bf16.mxu1 %v3063_v0 }
0x164a   :  { %v1934_v18 = vld [vmem:[#allocation2] sm:$0xff]  ;;  %2997 = vpow2.f32 %v2404_v19  ;;  %v970_v35 = vpop.permute.xlu0 %969  ;;  %v744_v53 = vpop.permute.xlu1 %743 }
0x164b   :  { %2737 = vmatmul.mubr.msk.f32.vlgmr.msra.gmra.mrb[16].mxu0 %vm31_vm0, %v1934_v18  ;;  %2999 = vpow2.f32 %v2416_v20  ;;  %v746_v59 = vadd.f32 %v744_v53, %v736_v16 }
0x164c   :  { %2882 = vmatpush3.bf16.msra.mxu0 %v3131_v5  ;;  %2758 = vmatprep.mubr.msk.f32.mxu0 %vm3064_vm1, %v3065_v4  ;;  %v2428_v5 = vmul.f32 -1.442695, %v1419_v51 }
0x164d   :  { %2883 = vmatprep.subr.bf16.mxu0 %v3063_v0 }
0x164e   :  { %3001 = vpow2.f32 %v2428_v5  ;;  %v1432_v42 = vpop.permute.xlu0 %1431  ;;  %v1206_v61 = vpop.permute.xlu1 %1205 }
0x164f   :  { %v1208_v10 = vadd.f32 %v1206_v61, %v1198_v2 }
0x1650   :  { %2885 = vmatpush3.bf16.msra.mxu0 %v3143_v9 }
0x1652   :  { %v1668_v33 = vpop.permute.xlu1 %1667 }
0x1653   :  { %v2996_v30 = vpop.eup %2995  ;;  %v1670_v18 = vadd.f32 %v1668_v33, %v1660_v14 }
0x1654   :  { %285 = vrot.lane.b32.xlu1 %v2996_v30, %s3068_s19  ;;  %v2998_v23 = vpop.eup %2997 }
0x1655   :  { %v501_v25 = vadd.f32 1.0, %v2998_v23  ;;  %v3000_v27 = vpop.eup %2999 }
0x1656   :  { %v963_v28 = vadd.f32 1.0, %v3000_v27 }
0x1658   :  { %289 = vrot.lane.b32.xlu1 %v2394_v12, %s3069_s30  ;;  %v3002_v45 = vpop.eup %3001 }
0x1659   :  { %v1425_v44 = vadd.f32 1.0, %v3002_v45 }
0x1716   :  { %v1880_v24 = vpop.f32.mrb[14].mxu1 }
0x1717   :  { %v1881_v9 = vadd.f32 %v3422_v15, %v1880_v24  ;;  %v2727_v26 = vpop.f32.mrb[15].mxu1 }
0x1719   :  { %3003 = vtanh.f32 %v1881_v9  ;;  %v2440_v48 = vmul.f32 -1.442695, %v1881_v9 }
0x171a   :  { %3005 = vrcp.f32 %v501_v25 }
0x171b   :  { %3007 = vrcp.f32 %v963_v28 }
0x171c   :  { %3009 = vrcp.f32 %v1425_v44 }
0x171d   :  { %3011 = vpow2.f32 %v2440_v48 }
0x171e   :  { %v3487_v29 = vpop.f32.mrb[16].mxu0 }
0x171f   :  { %v2738_v31 = vpop.f32.mrb[17].mxu0 }
0x1723   :  { %v3004_v32 = vpop.eup %3003 }
0x1724   :  { %1893 = vrot.lane.b32.xlu0 %v3004_v32, %s3068_s19  ;;  %v3490_v34 = vpop.eup %3005 }
0x1725   :  { %v510_v39 = vmul.f32 %v3490_v34, %v508_v49  ;;  %v3494_v40 = vpop.eup %3007  ;;  %v505_v56 = vmul.f32 %v3490_v34, %v3223_v63 }
0x1726   :  { %v972_v41 = vmul.f32 %v3494_v40, %v970_v35  ;;  %v3498_v43 = vpop.eup %3009  ;;  %v967_v62 = vmul.f32 %v3494_v40, %v3289_v1 }
0x1727   :  { %v1434_v46 = vmul.f32 %v3498_v43, %v1432_v42  ;;  %v3012_v50 = vpop.eup %3011  ;;  %v1429_v63 = vmul.f32 %v3498_v43, %v3355_v8  ;;  %v286_v8 = vpop.permute.xlu1 %285 }
0x1728   :  { %512 = vrot.lane.b32.xlu0 %v510_v39, %s3067_s2  ;;  %v1887_v51 = vadd.f32 1.0, %v3012_v50  ;;  %v288_v5 = vmul.f32 %v3446_v13, %v286_v8 }
0x172a   :  { %3013 = vrcp.f32 %v1887_v51 }
0x172b   :  { %v3523_v20 = vpop.permute.xlu1 %289 }
0x172c   :  { %974 = vrot.lane.b32.xlu0 %v972_v41, %s3067_s2  ;;  %v292_v23 = vmul.f32 %v3523_v20, %v288_v5 }
0x1730   :  { %1436 = vrot.lane.b32.xlu0 %v1434_v46, %s3067_s2 }
0x1734   :  { %v3502_v52 = vpop.eup %3013 }
0x1735   :  { %v1891_v24 = vmul.f32 %v3502_v52, %v3424_v21 }
0x1796   :  { %v1894_v54 = vpop.permute.xlu0 %1893 }
0x1797   :  { %v1896_v55 = vmul.f32 %v3502_v52, %v1894_v54 }
0x1799   :  { %1898 = vrot.lane.b32.xlu0 %v1896_v55, %s3067_s2 }
0x179a   :  { %v513_v22 = vpop.permute.xlu0 %512 }
0x179b   :  { %v515_v58 = vadd.f32 %v513_v22, %v505_v56 }
0x179d   :  { %3015 = vtanh.f32 %v515_v58 }
0x179e   :  { %v975_v6 = vpop.permute.xlu0 %974  ;;  %3017 = vtanh.f32 %v746_v59 }
0x179f   :  { %v977_v7 = vadd.f32 %v975_v6, %v967_v62 }
0x17a1   :  { %3019 = vtanh.f32 %v977_v7 }
0x17a2   :  { %v1437_v11 = vpop.permute.xlu0 %1436  ;;  %3021 = vtanh.f32 %v1208_v10 }
0x17a3   :  { %v1439_v17 = vadd.f32 %v1437_v11, %v1429_v63 }
0x17a5   :  { %3023 = vtanh.f32 %v1439_v17 }
0x17a6   :  { %3025 = vtanh.f32 %v1670_v18 }
0x17a7   :  { %v3016_v1 = vpop.eup %3015 }
0x17a8   :  { %518 = vrot.lane.b32.xlu0 %v3016_v1, %s3068_s19  ;;  %v3018_v37 = vpop.eup %3017 }
0x17ab   :  { %v3020_v30 = vpop.eup %3019 }
0x17ac   :  { %980 = vrot.lane.b32.xlu1 %v3020_v30, %s3068_s19  ;;  %749 = vrot.lane.b32.xlu0 %v3018_v37, %s3068_s19  ;;  %v3022_v12 = vpop.eup %3021 }
0x17af   :  { %v3024_v19 = vpop.eup %3023 }
0x17b0   :  { %1442 = vrot.lane.b32.xlu1 %v3024_v19, %s3068_s19  ;;  %1211 = vrot.lane.b32.xlu0 %v3022_v12, %s3068_s19  ;;  %v3026_v47 = vpop.eup %3025 }
0x17b4   :  { %1673 = vrot.lane.b32.xlu0 %v3026_v47, %s3068_s19 }
0x17b8   :  { %294 = vrot.lane.b32.xlu0 %v292_v23, %s3067_s2 }
0x180b   :  { %v1899_v25 = vpop.permute.xlu0 %1898 }
0x180c   :  { %v1901_v9 = vadd.f32 %v1899_v25, %v1891_v24 }
0x180e   :  { %3027 = vtanh.f32 %v1901_v9 }
0x1818   :  { %v3028_v26 = vpop.eup %3027 }
0x1819   :  { %1904 = vrot.lane.b32.xlu1 %v3028_v26, %s3068_s19 }
0x181a   :  { %v519_v27 = vpop.permute.xlu0 %518 }
0x181b   :  { %v521_v28 = vmul.f32 %v3490_v34, %v519_v27 }
0x181d   :  { %v522_v13 = vmul.f32 %v521_v28, %v3523_v20  ;;  %v3622_v28 = vld [vmem:[%s3686_s1] ss:$0 sm:$0xff] }
0x181e   :  { %v750_v45 = vpop.permute.xlu0 %749  ;;  %v981_v44 = vpop.permute.xlu1 %980 }
0x181f   :  { %v752_v49 = vmul.f32 %v3451_v57, %v750_v45  ;;  %v983_v31 = vmul.f32 %v3494_v40, %v981_v44  ;;  %524 = vrot.lane.b32.xlu1 %v522_v13, %s3067_s2  ;;  %v3629_v44 = vld [vmem:[%s3687_s3] ss:$0 sm:$0xff] }
0x1821   :  { %v753_v32 = vmul.f32 %v752_v49, %v3523_v20  ;;  %v984_v35 = vmul.f32 %v983_v31, %v3523_v20 }
0x1822   :  { %v1212_v39 = vpop.permute.xlu0 %1211  ;;  %v1443_v41 = vpop.permute.xlu1 %1442 }
0x1823   :  { %v1214_v42 = vmul.f32 %v3456_v60, %v1212_v39  ;;  %v1445_v34 = vmul.f32 %v3498_v43, %v1443_v41  ;;  %755 = vrot.lane.b32.xlu0 %v753_v32, %s3067_s2  ;;  %986 = vrot.lane.b32.xlu1 %v984_v35, %s3067_s2  ;;  %v13_v60 = vstv %s3691_s7 }
0x1824   :  { %14 = vst [vmem:[#allocation5] sm:$0x1] %v13_v60 }
0x1825   :  { %v1215_v57 = vmul.f32 %v1214_v42, %v3523_v20  ;;  %v1446_v40 = vmul.f32 %v1445_v34, %v3523_v20 }
0x1826   :  { %v1674_v46 = vpop.permute.xlu0 %1673 }
0x1827   :  { %v1676_v48 = vmul.f32 %v3461_v3, %v1674_v46  ;;  %1217 = vrot.lane.b32.xlu0 %v1215_v57, %s3067_s2  ;;  %1448 = vrot.lane.b32.xlu1 %v1446_v40, %s3067_s2 }
0x1829   :  { %v1677_v50 = vmul.f32 %v1676_v48, %v3523_v20 }
0x182a   :  { %v295_v43 = vpop.permute.xlu0 %294 }
0x182b   :  { %1679 = vrot.lane.b32.xlu0 %v1677_v50, %s3067_s2  ;;  %v297_v3 = vsel %vm31_vm0, %v295_v43, 0.0  ;;  %v3565_v10 = vld [vmem:[#allocation5] ss:$0 sm:$0xff] }
0x184a   :  { %298 = vadd.xlane.f32.xlu0 %v297_v3 }
0x188b   :  { %v1905_v51 = vpop.permute.xlu1 %1904 }
0x188c   :  { %v1907_v53 = vmul.f32 %v3502_v52, %v1905_v51 }
0x188e   :  { %v1908_v54 = vmul.f32 %v1907_v53, %v3523_v20 }
0x1890   :  { %1910 = vrot.lane.b32.xlu1 %v1908_v54, %s3067_s2 }
0x1891   :  { %v525_v55 = vpop.permute.xlu1 %524 }
0x1892   :  { %v527_v52 = vsel %vm31_vm0, %v525_v55, 0.0 }
0x1895   :  { %v756_v56 = vpop.permute.xlu0 %755  ;;  %v987_v16 = vpop.permute.xlu1 %986 }
0x1896   :  { %v758_v22 = vsel %vm31_vm0, %v756_v56, 0.0  ;;  %v989_v58 = vsel %vm31_vm0, %v987_v16, 0.0 }
0x1897   :  { %759 = vadd.xlane.f32.xlu0 %v758_v22 }
0x1899   :  { %v1449_v59 = vpop.permute.xlu1 %1448  ;;  %v1218_v62 = vpop.permute.xlu0 %1217 }
0x189a   :  { %v1451_v61 = vsel %vm31_vm0, %v1449_v59, 0.0  ;;  %v1220_v2 = vsel %vm31_vm0, %v1218_v62, 0.0 }
0x189b   :  { %990 = vadd.xlane.f32.xlu0 %v989_v58 }
0x189d   :  { %v1680_v6 = vpop.permute.xlu0 %1679 }
0x189e   :  { %v1682_v7 = vsel %vm31_vm0, %v1680_v6, 0.0 }
0x189f   :  { %1452 = vadd.xlane.f32.xlu0 %v1451_v61 }
0x18b4   :  { %528 = vadd.xlane.f32.xlu1 %v527_v52 }
0x18b8   :  { %1221 = vadd.xlane.f32.xlu1 %v1220_v2 }
0x18bc   :  { %1683 = vadd.xlane.f32.xlu1 %v1682_v7 }
0x18d7   :  { %v299_v63 = vpop.xlane.xlu0 %298 }
0x18d8   :  { %v300_v33 = vadd.f32 %v3565_v10, %v299_v63 }
0x18da   :  { %308 = vst.msk [vmem:[#allocation4] sm:$0xff] %vm34_vm2, %v300_v33  ;;  %309 = vst.msk [vmem:[%s3692_s8] sm:$0xff] %vm34_vm2, %v300_v33 }
0x1902   :  { %v1911_v11 = vpop.permute.xlu1 %1910 }
0x1903   :  { %v1913_v14 = vsel %vm31_vm0, %v1911_v11, 0.0 }
0x1904   :  { %1914 = vadd.xlane.f32.xlu0 %v1913_v14 }
0x191a   :  { %1920 = vrot.lane.b32.xlu0 %v3424_v21, %s3069_s30 }
0x1924   :  { %v760_v17 = vpop.xlane.xlu0 %759 }
0x1925   :  { %v761_v18 = vadd.f32 %v3565_v10, %v760_v17 }
0x1927   :  { %2411 = vst.msk [vmem:[%s3692_s8 + $0x10] sm:$0xff] %vm34_vm2, %v761_v18 }
0x1928   :  { %v991_v1 = vpop.xlane.xlu0 %990 }
0x1929   :  { %v992_v37 = vadd.f32 %v3565_v10, %v991_v1 }
0x192b   :  { %2417 = vst.msk [vmem:[%s3692_s8 + $0x18] sm:$0xff] %vm34_vm2, %v992_v37 }
0x192c   :  { %v1453_v30 = vpop.xlane.xlu0 %1452 }
0x192d   :  { %v1454_v8 = vadd.f32 %v3565_v10, %v1453_v30 }
0x192f   :  { %2429 = vst.msk [vmem:[%s3692_s8 + $0x28] sm:$0xff] %vm34_vm2, %v1454_v8 }
0x1941   :  { %v529_v21 = vpop.xlane.xlu1 %528 }
0x1942   :  { %v530_v12 = vadd.f32 %v3565_v10, %v529_v21 }
0x1944   :  { %538 = vst.msk [vmem:[#allocation4] sm:$0xff] %vm34_vm2, %v530_v12  ;;  %2405 = vst.msk [vmem:[%s3692_s8 + $0x8] sm:$0xff] %vm34_vm2, %v530_v12 }
0x1945   :  { %769 = vst.msk [vmem:[#allocation4] sm:$0xff] %vm34_vm2, %v761_v18  ;;  %v1222_v19 = vpop.xlane.xlu1 %1221 }
0x1946   :  { %1000 = vst.msk [vmem:[#allocation4] sm:$0xff] %vm34_vm2, %v992_v37  ;;  %v1223_v47 = vadd.f32 %v3565_v10, %v1222_v19 }
0x1948   :  { %1231 = vst.msk [vmem:[#allocation4] sm:$0xff] %vm34_vm2, %v1223_v47  ;;  %2423 = vst.msk [vmem:[%s3692_s8 + $0x20] sm:$0xff] %vm34_vm2, %v1223_v47 }
0x1949   :  { %1462 = vst.msk [vmem:[#allocation4] sm:$0xff] %vm34_vm2, %v1454_v8  ;;  %v1684_v5 = vpop.xlane.xlu1 %1683 }
0x194a   :  { %v1685_v23 = vadd.f32 %v3565_v10, %v1684_v5 }
0x194c   :  { %1693 = vst.msk [vmem:[#allocation4] sm:$0xff] %vm34_vm2, %v1685_v23  ;;  %2435 = vst.msk [vmem:[%s3692_s8 + $0x30] sm:$0xff] %vm34_vm2, %v1685_v23 }
0x1991   :  { %v1915_v24 = vpop.xlane.xlu0 %1914 }
0x1992   :  { %v1916_v25 = vadd.f32 %v3565_v10, %v1915_v24 }
0x1994   :  { %1924 = vst.msk [vmem:[#allocation4] sm:$0xff] %vm34_vm2, %v1916_v25  ;;  %2441 = vst.msk [vmem:[%s3692_s8 + $0x38] sm:$0xff] %vm34_vm2, %v1916_v25 }
0x1995   :  { %v1921_v9 = vpop.permute.xlu0 %1920 }
0x1996   :  { %1923 = vst.msk [vmem:[#allocation3] sm:$0xff] %vm31_vm0, %v1921_v9 }
0x199b   :  { %v1927_v26 = vld [vmem:[#allocation4] sm:$0xff] }
0x199c   :  { %1930 = vperm.xlu1 %2900, %v1927_v26  }
0x199d   :  { %v2017_v32 = vld [vmem:[#allocation3] sm:$0xff] }
0x1a1b   :  { %v1931_v27 = vpop.permute.xlu1 %1930 }
0x1a1c   :  { %v1933_v13 = vmul.f32 %v3622_v28, %v1931_v27 }
0x1a1e   :  { %v2008_v45 = vadd.f32 %v3487_v29, %v1933_v13 }
0x1a20   :  { %v2009_v49 = vadd.f32 %v3629_v44, %v2008_v45 }
0x1a22   :  { %3029 = vtanh.f32 %v2009_v49  ;;  %v2443_v35 = vmul.f32 -1.442695, %v2009_v49 }
0x1a24   :  { %3031 = vpow2.f32 %v2443_v35 }
0x1a2c   :  { %v3030_v31 = vpop.eup %3029 }
0x1a2d   :  { %2024 = vrot.lane.b32.xlu1 %v3030_v31, %s3068_s19 }
0x1a2e   :  { %v3032_v39 = vpop.eup %3031 }
0x1a2f   :  { %v2013_v41 = vadd.f32 1.0, %v3032_v39 }
0x1a31   :  { %2019 = vrot.lane.b32.xlu1 %v2017_v32, %s3067_s2  ;;  %3033 = vrcp.f32 %v2013_v41 }
0x1a3b   :  { %v3034_v29 = vpop.eup %3033 }
0x1a9f   :  { %v2025_v42 = vpop.permute.xlu1 %2024 }
0x1aa0   :  { %v2027_v34 = vmul.f32 %v3034_v29, %v2025_v42 }
0x1aa2   :  { %2029 = vrot.lane.b32.xlu0 %v2027_v34, %s3067_s2 }
0x1aa3   :  { %v2020_v57 = vpop.permute.xlu1 %2019 }
0x1aa4   :  { %v2022_v40 = vmul.f32 %v3034_v29, %v2020_v57 }
0x1b14   :  { %v2030_v46 = vpop.permute.xlu0 %2029 }
0x1b15   :  { %v2032_v48 = vadd.f32 %v2030_v46, %v2022_v40 }
0x1b17   :  { %3035 = vtanh.f32 %v2032_v48 }
0x1b21   :  { %v3036_v50 = vpop.eup %3035 }
0x1b22   :  { %2035 = vrot.lane.b32.xlu1 %v3036_v50, %s3068_s19 }
0x1b94   :  { %v2036_v60 = vpop.permute.xlu1 %2035 }
0x1b95   :  { %v2038_v43 = vmul.f32 %v3034_v29, %v2036_v60 }
0x1b97   :  { %2040 = vrot.lane.b32.xlu0 %v2038_v43, %s3067_s2 }
0x1c09   :  { %v2041_v3 = vpop.permute.xlu0 %2040 }
0x1c0a   :  { %2148 = vst.msk [vmem:[#allocation2] sm:$0xff] %vm31_vm0, %v2041_v3  ;;  %2748 = vmatmul.mubr.msk.f32.vlgmr.msra.gmra.mrb[16].mxu1 %vm31_vm0, %v2041_v3 }
0x1c0b   :  { %2888 = vmatpush3.bf16.msra.mxu1 %v3186_v36  ;;  %2769 = vmatprep.mubr.msk.f32.mxu1 %vm3064_vm1, %v3065_v4 }
0x1c0c   :  { %2889 = vmatprep.subr.bf16.mxu1 %v3063_v0 }
0x1c0f   :  { %2891 = vmatpush3.bf16.msra.mxu1 %v3192_v38 }
0x1c11   :  { %v2164_v51 = vld [vmem:[#allocation2] sm:$0xff] }
0x1c12   :  { %2759 = vmatmul.mubr.msk.f32.vlgmr.msra.gmra.mrb[18].mxu0 %vm31_vm0, %v2164_v51 }
0x1cdd   :  { %v2110_v53 = vpop.f32.mrb[16].mxu1 }
0x1cde   :  { %v2111_v54 = vadd.f32 %v3422_v15, %v2110_v53  ;;  %v2749_v55 = vpop.f32.mrb[17].mxu1 }
0x1ce0   :  { %3037 = vtanh.f32 %v2111_v54  ;;  %v2445_v36 = vmul.f32 -1.442695, %v2111_v54 }
0x1ce2   :  { %3039 = vpow2.f32 %v2445_v36 }
0x1ce5   :  { %v2234_v56 = vpop.f32.mrb[18].mxu0 }
0x1ce6   :  { %v2760_v16 = vpop.f32.mrb[19].mxu0 }
0x1cea   :  { %v3038_v22 = vpop.eup %3037 }
0x1ceb   :  { %2123 = vrot.lane.b32.xlu1 %v3038_v22, %s3068_s19 }
0x1cec   :  { %v3040_v4 = vpop.eup %3039 }
0x1ced   :  { %v2117_v58 = vadd.f32 1.0, %v3040_v4 }
0x1cef   :  { %3041 = vrcp.f32 %v2117_v58 }
0x1cf9   :  { %v3042_v0 = vpop.eup %3041 }
0x1cfa   :  { %v2121_v61 = vmul.f32 %v3042_v0, %v2032_v48 }
0x1d5d   :  { %v2124_v38 = vpop.permute.xlu1 %2123 }
0x1d5e   :  { %v2126_v59 = vmul.f32 %v3042_v0, %v2124_v38 }
0x1d60   :  { %2128 = vrot.lane.b32.xlu0 %v2126_v59, %s3067_s2 }
0x1dd2   :  { %v2129_v62 = vpop.permute.xlu0 %2128 }
0x1dd3   :  { %v2131_v52 = vadd.f32 %v2129_v62, %v2121_v61 }
0x1dd5   :  { %3043 = vtanh.f32 %v2131_v52 }
0x1ddf   :  { %v3044_v2 = vpop.eup %3043 }
0x1de0   :  { %2134 = vrot.lane.b32.xlu1 %v3044_v2, %s3068_s19 }
0x1e52   :  { %v2135_v6 = vpop.permute.xlu1 %2134 }
0x1e53   :  { %v2137_v7 = vmul.f32 %v3042_v0, %v2135_v6 }
0x1e55   :  { %v2138_v63 = vmul.f32 %v2137_v7, %v3523_v20 }
0x1e57   :  { %2140 = vrot.lane.b32.xlu0 %v2138_v63, %s3067_s2 }
0x1ec9   :  { %v2141_v33 = vpop.permute.xlu0 %2140 }
0x1eca   :  { %v2143_v11 = vsel %vm31_vm0, %v2141_v33, 0.0 }
0x1ecb   :  { %2144 = vadd.xlane.f32.xlu1 %v2143_v11 }
0x1f58   :  { %v2145_v14 = vpop.xlane.xlu1 %2144 }
0x1f59   :  { %v2146_v17 = vadd.f32 %v3565_v10, %v2145_v14 }
0x1f5b   :  { %2154 = vst.msk [vmem:[#allocation4] sm:$0xff] %vm34_vm2, %v2146_v17  ;;  %2446 = vst.msk [vmem:[%s3692_s8 + $0x40] sm:$0xff] %vm34_vm2, %v2146_v17 }
0x1f62   :  { %v2157_v18 = vld [vmem:[#allocation4] sm:$0xff] }
0x1f63   :  { %2160 = vperm.xlu0 %2899, %v2157_v18  }
0x1f67   :  { %2150 = vrot.lane.b32.xlu0 %v2032_v48, %s3069_s30 }
0x1fe2   :  { %v2161_v1 = vpop.permute.xlu0 %2160 }
0x1fe3   :  { %v2163_v37 = vmul.f32 %v3622_v28, %v2161_v1 }
0x1fe5   :  { %v2238_v30 = vadd.f32 %v2234_v56, %v2163_v37 }
0x1fe6   :  { %v2151_v8 = vpop.permute.xlu0 %2150 }
0x1fe7   :  { %v2239_v21 = vadd.f32 %v3629_v44, %v2238_v30  ;;  %2153 = vst.msk [vmem:[#allocation3] sm:$0xff] %vm31_vm0, %v2151_v8 }
0x1fe9   :  { %3045 = vtanh.f32 %v2239_v21  ;;  %v2448_v47 = vmul.f32 -1.442695, %v2239_v21 }
0x1feb   :  { %3047 = vpow2.f32 %v2448_v47 }
0x1fee   :  { %v2247_v19 = vld [vmem:[#allocation3] sm:$0xff] }
0x1ff3   :  { %v3046_v12 = vpop.eup %3045 }
0x1ff4   :  { %2254 = vrot.lane.b32.xlu0 %v3046_v12, %s3068_s19 }
0x1ff5   :  { %v3048_v5 = vpop.eup %3047 }
0x1ff6   :  { %v2243_v23 = vadd.f32 1.0, %v3048_v5 }
0x1ff8   :  { %2249 = vrot.lane.b32.xlu0 %v2247_v19, %s3067_s2  ;;  %3049 = vrcp.f32 %v2243_v23 }
0x2002   :  { %v3050_v24 = vpop.eup %3049 }
0x2066   :  { %v2255_v25 = vpop.permute.xlu0 %2254 }
0x2067   :  { %v2257_v9 = vmul.f32 %v3050_v24, %v2255_v25 }
0x2069   :  { %2259 = vrot.lane.b32.xlu0 %v2257_v9, %s3067_s2 }
0x206a   :  { %v2250_v26 = vpop.permute.xlu0 %2249 }
0x206b   :  { %v2252_v27 = vmul.f32 %v3050_v24, %v2250_v26 }
0x20db   :  { %v2260_v28 = vpop.permute.xlu0 %2259 }
0x20dc   :  { %v2262_v13 = vadd.f32 %v2260_v28, %v2252_v27 }
0x20de   :  { %3051 = vtanh.f32 %v2262_v13 }
0x20e8   :  { %v3052_v45 = vpop.eup %3051 }
0x20e9   :  { %2265 = vrot.lane.b32.xlu0 %v3052_v45, %s3068_s19 }
0x215b   :  { %v2266_v44 = vpop.permute.xlu0 %2265 }
0x215c   :  { %v2268_v49 = vmul.f32 %v3050_v24, %v2266_v44 }
0x215e   :  { %2270 = vrot.lane.b32.xlu0 %v2268_v49, %s3067_s2 }
0x21d0   :  { %v2271_v31 = vpop.permute.xlu0 %2270 }
0x21d1   :  { %2378 = vst.msk [vmem:[#allocation2] sm:$0xff] %vm31_vm0, %v2271_v31  ;;  %2770 = vmatmul.mubr.msk.f32.vlgmr.msra.gmra.mrb[18].mxu1 %vm31_vm0, %v2271_v31 }
0x22a4   :  { %v2340_v32 = vpop.f32.mrb[18].mxu1 }
0x22a5   :  { %v2341_v35 = vadd.f32 %v3422_v15, %v2340_v32  ;;  %v2771_v39 = vpop.f32.mrb[19].mxu1 }
0x22a7   :  { %3053 = vtanh.f32 %v2341_v35  ;;  %v2450_v29 = vmul.f32 -1.442695, %v2341_v35 }
0x22a9   :  { %3055 = vpow2.f32 %v2450_v29 }
0x22b1   :  { %v3054_v41 = vpop.eup %3053 }
0x22b2   :  { %2353 = vrot.lane.b32.xlu0 %v3054_v41, %s3068_s19 }
0x22b3   :  { %v3056_v42 = vpop.eup %3055 }
0x22b4   :  { %v2347_v34 = vadd.f32 1.0, %v3056_v42 }
0x22b6   :  { %3057 = vrcp.f32 %v2347_v34 }
0x22c0   :  { %v3058_v57 = vpop.eup %3057 }
0x22c1   :  { %v2351_v48 = vmul.f32 %v3058_v57, %v2262_v13 }
0x2324   :  { %v2354_v40 = vpop.permute.xlu0 %2353 }
0x2325   :  { %v2356_v46 = vmul.f32 %v3058_v57, %v2354_v40 }
0x2327   :  { %2358 = vrot.lane.b32.xlu0 %v2356_v46, %s3067_s2 }
0x2399   :  { %v2359_v50 = vpop.permute.xlu0 %2358 }
0x239a   :  { %v2361_v60 = vadd.f32 %v2359_v50, %v2351_v48 }
0x239c   :  { %3059 = vtanh.f32 %v2361_v60 }
0x23a6   :  { %v3060_v15 = vpop.eup %3059 }
0x23a7   :  { %2364 = vrot.lane.b32.xlu1 %v3060_v15, %s3068_s19 }
0x23ab   :  { %2380 = vrot.lane.b32.xlu1 %v2262_v13, %s3069_s30 }
0x2419   :  { %v2365_v43 = vpop.permute.xlu1 %2364 }
0x241a   :  { %v2367_v3 = vmul.f32 %v3058_v57, %v2365_v43 }
0x241c   :  { %v2368_v51 = vmul.f32 %v2367_v3, %v3523_v20 }
0x241d   :  { %v2381_v53 = vpop.permute.xlu1 %2380 }
0x241e   :  { %2383 = vst.msk [vmem:[#allocation3] sm:$0xff] %vm31_vm0, %v2381_v53  ;;  %2370 = vrot.lane.b32.xlu0 %v2368_v51, %s3067_s2 }
0x2490   :  { %v2371_v54 = vpop.permute.xlu0 %2370 }
0x2491   :  { %v2373_v55 = vsel %vm31_vm0, %v2371_v54, 0.0 }
0x2492   :  { %2374 = vadd.xlane.f32.xlu0 %v2373_v55 }
0x251f   :  { %v2375_v56 = vpop.xlane.xlu0 %2374 }
0x2520   :  { %v2376_v16 = vadd.f32 %v3565_v10, %v2375_v56 }
0x2522   :  { %2384 = vst.msk [vmem:[#allocation4] sm:$0xff] %vm34_vm2, %v2376_v16  ;;  %2451 = vst.msk [vmem:[%s3692_s8 + $0x48] sm:$0xff] %vm34_vm2, %v2376_v16 }

</bundles_post_ra>
